<compile_context>
chip_gen: v6e
topology: v6e:2x2x1
jax: 0.10.0
libtpu: 0.0.40
codegen_flags: <defaults>
</compile_context>

<pallas_src>
import jax
import jax.numpy as jnp
from jax import lax
from jax.experimental import pallas as pl
from jax.experimental.pallas import tpu as pltpu
import numpy as np

# ---- static sizes (from the module) ------------------------------------------------
H = W = 16
KH = KW = 3
OH, OW = H - KH + 1, W - KW + 1          # 14, 14  (conv, VALID, stride 1)
PH, PW = OH - 3 + 1, OW - 3 + 1          # 12, 12  (maxpool 3x3, stride 1)
C_OUT = 32
FLAT = C_OUT * PH * PW                   # 4608
EPS = 1e-5
VMEM_LIMIT = 48 * 1024 * 1024            # explicit scoped-VMEM budget (> v5e/v6e defaults, < v7x physical)


# ---- pass 1: per-block partial BN statistics of the conv output --------------------
def _make_stats_kernel(nb, n_real):
    def stats_kernel(x_ref, w_ref, b_ref, sums_ref):
        # x_ref: (nb, H, W)  w_ref: (9, C)  b_ref: (1, C)  sums_ref: (1, 2, C)
        base = pl.program_id(0) * nb
        wks = [w_ref[k][None, None, :] for k in range(KH * KW)]   # (1, 1, C) each
        bias = b_ref[...]                                          # (1, C)

        def img_body(n, carry):
            s0, s1 = carry                                         # (1, C) each
            xi = x_ref[n]                                          # (H, W)
            acc = jnp.zeros((OH, OW, C_OUT), jnp.float32)          # channels on lanes
            for dy in range(KH):
                for dx in range(KW):
                    patch = xi[dy:dy + OH, dx:dx + OW]             # (OH, OW)
                    acc = acc + patch[:, :, None] * wks[dy * KW + dx]
            acc = acc + bias                                       # conv bias
            # mask out padded images so the batch statistics stay exact
            valid = (base + n < n_real).astype(jnp.float32)
            s0 = s0 + valid * jnp.sum(acc, axis=(0, 1))[None, :]
            s1 = s1 + valid * jnp.sum(acc * acc, axis=(0, 1))[None, :]
            return s0, s1

        zero = jnp.zeros((1, C_OUT), jnp.float32)
        s0, s1 = lax.fori_loop(0, nb, img_body, (zero, zero))
        sums_ref[0, 0, :] = s0[0]
        sums_ref[0, 1, :] = s1[0]
    return stats_kernel


# ---- pass 2: conv (recomputed) + folded BN affine + ReLU + 3x3/s1 max-pool ----------
#      output is written directly in NCHW-flattened order: out[n, c, ph*PW + pw]
def _make_fused_kernel(nb):
    def fused_kernel(x_ref, w_ref, scale_ref, shift_ref, out_ref, y_ref):
        # x_ref: (nb, H, W)  w_ref: (9, C, 1)  scale/shift: (C, 1)
        # out_ref: (nb, C, PH*PW)   y_ref: VMEM scratch (OH, C, OW)
        wks = [w_ref[k] for k in range(KH * KW)]                   # (C, 1) each
        scale = scale_ref[...]                                     # (C, 1)
        shift = shift_ref[...]                                     # (C, 1) (conv bias folded in)

        def img_body(n, carry):
            xi = x_ref[n]                                          # (H, W)
            # conv + BN affine + ReLU, one output row at a time (channels on sublanes)
            for oh in range(OH):
                acc = jnp.zeros((C_OUT, OW), jnp.float32)
                for dy in range(KH):
                    xrow = xi[oh + dy][None, :]                    # (1, W)
                    for dx in range(KW):
                        acc = acc + xrow[:, dx:dx + OW] * wks[dy * KW + dx]
                y_ref[oh] = jnp.maximum(acc * scale + shift, 0.0)  # (C, OW)
            # 3x3 / stride-1 max pool; init from the (0,0) window, 8 more comparisons
            for ph in range(PH):
                row = y_ref[ph, :, 0:PW]                           # (C, PW)
                for dy in range(3):
                    for dx in range(3):
                        if dy == 0 and dx == 0:
                            continue
                        row = jnp.maximum(row, y_ref[ph + dy, :, dx:dx + PW])
                # channel-major flattened row -> contiguous NCHW order in HBM
                out_ref[n, :, pl.ds(ph * PW, PW)] = row
            return carry

        lax.fori_loop(0, nb, img_body, 0)
    return fused_kernel


# ---- wrapper ------------------------------------------------------------------------
def cnn_forward(i, w, b, gamma, beta, *, block_images=64):
    """i: (B, T, 1, H, W) float32.  Returns (B, T, C_OUT*PH*PW) float32."""
    B, T, Cin, Hi, Wi = i.shape
    assert Cin == 1 and Hi == H and Wi == W
    N = B * T
    nb = min(block_images, N)            # images per grid step
    G = pl.cdiv(N, nb)
    n_pad = G * nb

    x = i.reshape(N, H, W).astype(jnp.float32)
    if n_pad != N:
        x = jnp.pad(x, ((0, n_pad - N), (0, 0), (0, 0)))

    w9 = jnp.transpose(w.reshape(C_OUT, KH * KW), (1, 0)).astype(jnp.float32)  # (9, C)
    b_row = b.reshape(1, C_OUT).astype(jnp.float32)

    compiler_params = pltpu.CompilerParams(
        dimension_semantics=("parallel",), vmem_limit_bytes=VMEM_LIMIT)

    # ---- pass 1: partial (sum, sum-of-squares) per block; reduced in XLA -------------
    part_sums = pl.pallas_call(
        _make_stats_kernel(nb, N),
        out_shape=jax.ShapeDtypeStruct((G, 2, C_OUT), jnp.float32),
        grid_spec=pltpu.PrefetchScalarGridSpec(
            num_scalar_prefetch=0,
            grid=(G,),
            in_specs=[pl.BlockSpec((nb, H, W), lambda g: (g, 0, 0)),
                      pl.BlockSpec((KH * KW, C_OUT), lambda g: (0, 0)),
                      pl.BlockSpec((1, C_OUT), lambda g: (0, 0))],
            out_specs=pl.BlockSpec((1, 2, C_OUT), lambda g: (g, 0, 0))),
        compiler_params=compiler_params,
    )(x, w9, b_row)

    sums = jnp.sum(part_sums, axis=0)                      # (2, C)
    cnt = jnp.float32(N * OH * OW)
    mean = sums[0] / cnt
    var = jnp.maximum(sums[1] / cnt - mean * mean, 0.0)    # biased variance, clamped
    scale = gamma.astype(jnp.float32) / jnp.sqrt(var + EPS)
    shift = beta.astype(jnp.float32) + (b.astype(jnp.float32) - mean) * scale  # conv bias folded

    # ---- pass 2: fused conv + BN + ReLU + pool, NCHW-flattened output ---------------
    out_flat = pl.pallas_call(
        _make_fused_kernel(nb),
        out_shape=jax.ShapeDtypeStruct((n_pad, C_OUT, PH * PW), jnp.float32),
        grid_spec=pltpu.PrefetchScalarGridSpec(
            num_scalar_prefetch=0,
            grid=(G,),
            in_specs=[pl.BlockSpec((nb, H, W), lambda g: (g, 0, 0)),
                      pl.BlockSpec((KH * KW, C_OUT, 1), lambda g: (0, 0, 0)),
                      pl.BlockSpec((C_OUT, 1), lambda g: (0, 0)),
                      pl.BlockSpec((C_OUT, 1), lambda g: (0, 0))],
            out_specs=pl.BlockSpec((nb, C_OUT, PH * PW), lambda g: (g, 0, 0)),
            scratch_shapes=[pltpu.VMEM((OH, C_OUT, OW), jnp.float32)]),
        compiler_params=compiler_params,
    )(x, w9[:, :, None], scale.reshape(C_OUT, 1), shift.reshape(C_OUT, 1))

    # (N, C, PH*PW) is already contiguous NCHW order -> final view is free
    return out_flat[:N].reshape(B, T, FLAT)


# ---- pure-JAX reference (same math, for a sanity check) -----------------------------
def ref_forward(i, w, b, gamma, beta):
    B, T = i.shape[0], i.shape[1]
    x = i.reshape(-1, 1, H, W).astype(jnp.float32)
    conv = lax.conv_general_dilated(
        x, w.astype(jnp.float32), window_strides=(1, 1), padding="VALID",
        dimension_numbers=("NCHW", "OIHW", "NCHW")) + b.reshape(1, -1, 1, 1)
    mean = conv.mean(axis=(0, 2, 3))
    var = conv.var(axis=(0, 2, 3))
    y = (conv - mean.reshape(1, -1, 1, 1)) / jnp.sqrt(var.reshape(1, -1, 1, 1) + EPS)
    y = y * gamma.reshape(1, -1, 1, 1) + beta.reshape(1, -1, 1, 1)
    y = jnp.maximum(y, 0.0)
    pooled = lax.reduce_window(
        y, -jnp.inf, lax.max, (1, 1, 3, 3), (1, 1, 1, 1), "VALID")
    return pooled.reshape(B, T, -1)


if __name__ == "__main__":
    key = jax.random.PRNGKey(0)
    k_i, k_w, k_b, k_g, k_be = jax.random.split(key, 5)

    B, T = 2, 4
    i = jax.random.normal(k_i, (B, T, 1, H, W), dtype=jnp.float32)

    # deterministic synthetic parameters (shapes from the module's __init__)
    w = 0.1 * jax.random.normal(k_w, (C_OUT, 1, KH, KW), dtype=jnp.float32)  # conv1.weight
    b = 0.1 * jax.random.normal(k_b, (C_OUT,), dtype=jnp.float32)            # conv1.bias
    gamma = 1.0 + 0.1 * jax.random.normal(k_g, (C_OUT,), dtype=jnp.float32)  # batch1.weight
    beta = 0.1 * jax.random.normal(k_be, (C_OUT,), dtype=jnp.float32)        # batch1.bias

    out = jax.block_until_ready(cnn_forward(i, w, b, gamma, beta))
    assert out.shape == (B, T, FLAT), out.shape

    ref = jax.block_until_ready(ref_forward(i, w, b, gamma, beta))
    np.testing.assert_allclose(np.asarray(out), np.asarray(ref), rtol=1e-3, atol=1e-3)

    print("KERNEL_OK")
</pallas_src>

<mosaic_0001>
module attributes {stable_mosaic.version = 11 : i64} {
  func.func @stats_kernel(%arg0: i32, %arg1: memref<8x16x16xf32, #tpu.memory_space<vmem>>, %arg2: memref<9x32xf32, #tpu.memory_space<vmem>>, %arg3: memref<1x32xf32, #tpu.memory_space<vmem>>, %arg4: memref<1x2x32xf32, #tpu.memory_space<vmem>>) attributes {dimension_semantics = [#tpu.dimension_semantics<parallel>], iteration_bounds = array<i64: 1>, scalar_prefetch = 0 : i64, scratch_operands = 0 : i64, tpu.core_type = #tpu.core_type<tc>, window_params = [{transform_indices = @transform_0, window_bounds = array<i64: 8, 16, 16>}, {pipeline_mode = #tpu.pipeline_mode<synchronous>, transform_indices = @transform_1, window_bounds = array<i64: 9, 32>}, {pipeline_mode = #tpu.pipeline_mode<synchronous>, transform_indices = @transform_2, window_bounds = array<i64: 1, 32>}, {transform_indices = @transform_3, window_bounds = array<i64: 1, 2, 32>}]} {
    %c8_i32 = arith.constant 8 : i32
    %0 = arith.muli %arg0, %c8_i32 : i32
    %c0 = arith.constant 0 : index
    %c0_0 = arith.constant 0 : index
    %1 = vector.load %arg2[%c0, %c0_0] : memref<9x32xf32, #tpu.memory_space<vmem>>, vector<1x32xf32>
    %2 = vector.shape_cast %1 : vector<1x32xf32> to vector<32xf32>
    %3 = vector.shape_cast %2 : vector<32xf32> to vector<1x1x32xf32>
    %c1 = arith.constant 1 : index
    %c0_1 = arith.constant 0 : index
    %4 = vector.load %arg2[%c1, %c0_1] : memref<9x32xf32, #tpu.memory_space<vmem>>, vector<1x32xf32>
    %5 = vector.shape_cast %4 : vector<1x32xf32> to vector<32xf32>
    %6 = vector.shape_cast %5 : vector<32xf32> to vector<1x1x32xf32>
    %c2 = arith.constant 2 : index
    %c0_2 = arith.constant 0 : index
    %7 = vector.load %arg2[%c2, %c0_2] : memref<9x32xf32, #tpu.memory_space<vmem>>, vector<1x32xf32>
    %8 = vector.shape_cast %7 : vector<1x32xf32> to vector<32xf32>
    %9 = vector.shape_cast %8 : vector<32xf32> to vector<1x1x32xf32>
    %c3 = arith.constant 3 : index
    %c0_3 = arith.constant 0 : index
    %10 = vector.load %arg2[%c3, %c0_3] : memref<9x32xf32, #tpu.memory_space<vmem>>, vector<1x32xf32>
    %11 = vector.shape_cast %10 : vector<1x32xf32> to vector<32xf32>
    %12 = vector.shape_cast %11 : vector<32xf32> to vector<1x1x32xf32>
    %c4 = arith.constant 4 : index
    %c0_4 = arith.constant 0 : index
    %13 = vector.load %arg2[%c4, %c0_4] : memref<9x32xf32, #tpu.memory_space<vmem>>, vector<1x32xf32>
    %14 = vector.shape_cast %13 : vector<1x32xf32> to vector<32xf32>
    %15 = vector.shape_cast %14 : vector<32xf32> to vector<1x1x32xf32>
    %c5 = arith.constant 5 : index
    %c0_5 = arith.constant 0 : index
    %16 = vector.load %arg2[%c5, %c0_5] : memref<9x32xf32, #tpu.memory_space<vmem>>, vector<1x32xf32>
    %17 = vector.shape_cast %16 : vector<1x32xf32> to vector<32xf32>
    %18 = vector.shape_cast %17 : vector<32xf32> to vector<1x1x32xf32>
    %c6 = arith.constant 6 : index
    %c0_6 = arith.constant 0 : index
    %19 = vector.load %arg2[%c6, %c0_6] : memref<9x32xf32, #tpu.memory_space<vmem>>, vector<1x32xf32>
    %20 = vector.shape_cast %19 : vector<1x32xf32> to vector<32xf32>
    %21 = vector.shape_cast %20 : vector<32xf32> to vector<1x1x32xf32>
    %c7 = arith.constant 7 : index
    %c0_7 = arith.constant 0 : index
    %22 = vector.load %arg2[%c7, %c0_7] : memref<9x32xf32, #tpu.memory_space<vmem>>, vector<1x32xf32>
    %23 = vector.shape_cast %22 : vector<1x32xf32> to vector<32xf32>
    %24 = vector.shape_cast %23 : vector<32xf32> to vector<1x1x32xf32>
    %c8 = arith.constant 8 : index
    %c0_8 = arith.constant 0 : index
    %25 = vector.load %arg2[%c8, %c0_8] : memref<9x32xf32, #tpu.memory_space<vmem>>, vector<1x32xf32>
    %26 = vector.shape_cast %25 : vector<1x32xf32> to vector<32xf32>
    %27 = vector.shape_cast %26 : vector<32xf32> to vector<1x1x32xf32>
    %c0_9 = arith.constant 0 : index
    %c0_10 = arith.constant 0 : index
    %28 = vector.load %arg3[%c0_9, %c0_10] : memref<1x32xf32, #tpu.memory_space<vmem>>, vector<1x32xf32>
    %cst = arith.constant 0.000000e+00 : f32
    %29 = vector.broadcast %cst : f32 to vector<1x32xf32>
    %c0_i32 = arith.constant 0 : i32
    %c8_i32_11 = arith.constant 8 : i32
    %30 = arith.addi %c0_i32, %c8_i32_11 : i32
    %c1_i32 = arith.constant 1 : i32
    %31:2 = scf.for %arg5 = %c0_i32 to %30 step %c1_i32 iter_args(%arg6 = %29, %arg7 = %29) -> (vector<1x32xf32>, vector<1x32xf32>)  : i32 {
      %40 = arith.index_cast %arg5 : i32 to index
      %c0_19 = arith.constant 0 : index
      %c0_20 = arith.constant 0 : index
      %41 = vector.load %arg1[%40, %c0_19, %c0_20] : memref<8x16x16xf32, #tpu.memory_space<vmem>>, vector<1x16x16xf32>
      %42 = vector.shape_cast %41 : vector<1x16x16xf32> to vector<16x16xf32>
      %cst_21 = arith.constant 0.000000e+00 : f32
      %43 = vector.broadcast %cst_21 : f32 to vector<14x14x32xf32>
      %44 = vector.extract_strided_slice %42 {offsets = [0, 0], sizes = [14, 14], strides = [1, 1]} : vector<16x16xf32> to vector<14x14xf32>
      %45 = vector.shape_cast %44 : vector<14x14xf32> to vector<14x14x1xf32>
      %46 = vector.broadcast %45 : vector<14x14x1xf32> to vector<14x14x32xf32>
      %47 = vector.broadcast %3 : vector<1x1x32xf32> to vector<14x14x32xf32>
      %48 = arith.mulf %46, %47 : vector<14x14x32xf32>
      %49 = arith.addf %43, %48 : vector<14x14x32xf32>
      %50 = vector.extract_strided_slice %42 {offsets = [0, 1], sizes = [14, 14], strides = [1, 1]} : vector<16x16xf32> to vector<14x14xf32>
      %51 = vector.shape_cast %50 : vector<14x14xf32> to vector<14x14x1xf32>
      %52 = vector.broadcast %51 : vector<14x14x1xf32> to vector<14x14x32xf32>
      %53 = vector.broadcast %6 : vector<1x1x32xf32> to vector<14x14x32xf32>
      %54 = arith.mulf %52, %53 : vector<14x14x32xf32>
      %55 = arith.addf %49, %54 : vector<14x14x32xf32>
      %56 = vector.extract_strided_slice %42 {offsets = [0, 2], sizes = [14, 14], strides = [1, 1]} : vector<16x16xf32> to vector<14x14xf32>
      %57 = vector.shape_cast %56 : vector<14x14xf32> to vector<14x14x1xf32>
      %58 = vector.broadcast %57 : vector<14x14x1xf32> to vector<14x14x32xf32>
      %59 = vector.broadcast %9 : vector<1x1x32xf32> to vector<14x14x32xf32>
      %60 = arith.mulf %58, %59 : vector<14x14x32xf32>
      %61 = arith.addf %55, %60 : vector<14x14x32xf32>
      %62 = vector.extract_strided_slice %42 {offsets = [1, 0], sizes = [14, 14], strides = [1, 1]} : vector<16x16xf32> to vector<14x14xf32>
      %63 = vector.shape_cast %62 : vector<14x14xf32> to vector<14x14x1xf32>
      %64 = vector.broadcast %63 : vector<14x14x1xf32> to vector<14x14x32xf32>
      %65 = vector.broadcast %12 : vector<1x1x32xf32> to vector<14x14x32xf32>
      %66 = arith.mulf %64, %65 : vector<14x14x32xf32>
      %67 = arith.addf %61, %66 : vector<14x14x32xf32>
      %68 = vector.extract_strided_slice %42 {offsets = [1, 1], sizes = [14, 14], strides = [1, 1]} : vector<16x16xf32> to vector<14x14xf32>
      %69 = vector.shape_cast %68 : vector<14x14xf32> to vector<14x14x1xf32>
      %70 = vector.broadcast %69 : vector<14x14x1xf32> to vector<14x14x32xf32>
      %71 = vector.broadcast %15 : vector<1x1x32xf32> to vector<14x14x32xf32>
      %72 = arith.mulf %70, %71 : vector<14x14x32xf32>
      %73 = arith.addf %67, %72 : vector<14x14x32xf32>
      %74 = vector.extract_strided_slice %42 {offsets = [1, 2], sizes = [14, 14], strides = [1, 1]} : vector<16x16xf32> to vector<14x14xf32>
      %75 = vector.shape_cast %74 : vector<14x14xf32> to vector<14x14x1xf32>
      %76 = vector.broadcast %75 : vector<14x14x1xf32> to vector<14x14x32xf32>
      %77 = vector.broadcast %18 : vector<1x1x32xf32> to vector<14x14x32xf32>
      %78 = arith.mulf %76, %77 : vector<14x14x32xf32>
      %79 = arith.addf %73, %78 : vector<14x14x32xf32>
      %80 = vector.extract_strided_slice %42 {offsets = [2, 0], sizes = [14, 14], strides = [1, 1]} : vector<16x16xf32> to vector<14x14xf32>
      %81 = vector.shape_cast %80 : vector<14x14xf32> to vector<14x14x1xf32>
      %82 = vector.broadcast %81 : vector<14x14x1xf32> to vector<14x14x32xf32>
      %83 = vector.broadcast %21 : vector<1x1x32xf32> to vector<14x14x32xf32>
      %84 = arith.mulf %82, %83 : vector<14x14x32xf32>
      %85 = arith.addf %79, %84 : vector<14x14x32xf32>
      %86 = vector.extract_strided_slice %42 {offsets = [2, 1], sizes = [14, 14], strides = [1, 1]} : vector<16x16xf32> to vector<14x14xf32>
      %87 = vector.shape_cast %86 : vector<14x14xf32> to vector<14x14x1xf32>
      %88 = vector.broadcast %87 : vector<14x14x1xf32> to vector<14x14x32xf32>
      %89 = vector.broadcast %24 : vector<1x1x32xf32> to vector<14x14x32xf32>
      %90 = arith.mulf %88, %89 : vector<14x14x32xf32>
      %91 = arith.addf %85, %90 : vector<14x14x32xf32>
      %92 = vector.extract_strided_slice %42 {offsets = [2, 2], sizes = [14, 14], strides = [1, 1]} : vector<16x16xf32> to vector<14x14xf32>
      %93 = vector.shape_cast %92 : vector<14x14xf32> to vector<14x14x1xf32>
      %94 = vector.broadcast %93 : vector<14x14x1xf32> to vector<14x14x32xf32>
      %95 = vector.broadcast %27 : vector<1x1x32xf32> to vector<14x14x32xf32>
      %96 = arith.mulf %94, %95 : vector<14x14x32xf32>
      %97 = arith.addf %91, %96 : vector<14x14x32xf32>
      %98 = vector.shape_cast %28 : vector<1x32xf32> to vector<1x1x32xf32>
      %99 = vector.broadcast %98 : vector<1x1x32xf32> to vector<14x14x32xf32>
      %100 = arith.addf %97, %99 : vector<14x14x32xf32>
      %101 = arith.addi %0, %arg5 : i32
      %c8_i32_22 = arith.constant 8 : i32
      %102 = arith.cmpi slt, %101, %c8_i32_22 : i32
      %103 = arith.extui %102 : i1 to i32
      %104 = arith.sitofp %103 : i32 to f32
      %cst_23 = arith.constant dense<0.000000e+00> : vector<32xf32>
      %105 = vector.multi_reduction <add>, %100, %cst_23 [0, 1] : vector<14x14x32xf32> to vector<32xf32>
      %106 = vector.shape_cast %105 : vector<32xf32> to vector<1x32xf32>
      %107 = vector.broadcast %104 : f32 to vector<1x32xf32>
      %108 = arith.mulf %107, %106 : vector<1x32xf32>
      %109 = arith.addf %arg6, %108 : vector<1x32xf32>
      %110 = arith.mulf %100, %100 : vector<14x14x32xf32>
      %cst_24 = arith.constant dense<0.000000e+00> : vector<32xf32>
      %111 = vector.multi_reduction <add>, %110, %cst_24 [0, 1] : vector<14x14x32xf32> to vector<32xf32>
      %112 = vector.shape_cast %111 : vector<32xf32> to vector<1x32xf32>
      %113 = vector.broadcast %104 : f32 to vector<1x32xf32>
      %114 = arith.mulf %113, %112 : vector<1x32xf32>
      %115 = arith.addf %arg7, %114 : vector<1x32xf32>
      scf.yield %109, %115 : vector<1x32xf32>, vector<1x32xf32>
    }
    %c8_i32_12 = arith.constant 8 : i32
    %32 = vector.shape_cast %31#0 : vector<1x32xf32> to vector<32xf32>
    %c0_13 = arith.constant 0 : index
    %c0_14 = arith.constant 0 : index
    %c0_15 = arith.constant 0 : index
    %33 = vector.load %arg4[%c0_13, %c0_14, %c0_15] : memref<1x2x32xf32, #tpu.memory_space<vmem>>, vector<1x1x32xf32>
    %34 = vector.shape_cast %33 : vector<1x1x32xf32> to vector<32xf32>
    %35 = vector.shape_cast %32 : vector<32xf32> to vector<1x1x32xf32>
    tpu.vector_store %arg4[%c0_13, %c0_14, %c0_15], %35 {strides = array<i32>} : memref<1x2x32xf32, #tpu.memory_space<vmem>>, vector<1x1x32xf32>,
    %36 = vector.shape_cast %31#1 : vector<1x32xf32> to vector<32xf32>
    %c0_16 = arith.constant 0 : index
    %c1_17 = arith.constant 1 : index
    %c0_18 = arith.constant 0 : index
    %37 = vector.load %arg4[%c0_16, %c1_17, %c0_18] : memref<1x2x32xf32, #tpu.memory_space<vmem>>, vector<1x1x32xf32>
    %38 = vector.shape_cast %37 : vector<1x1x32xf32> to vector<32xf32>
    %39 = vector.shape_cast %36 : vector<32xf32> to vector<1x1x32xf32>
    tpu.vector_store %arg4[%c0_16, %c1_17, %c0_18], %39 {strides = array<i32>} : memref<1x2x32xf32, #tpu.memory_space<vmem>>, vector<1x1x32xf32>,
    return
  }
  func.func @transform_0(%arg0: i32) -> (i32, i32, i32) {
    %c0_i32 = arith.constant 0 : i32
    %c0_i32_0 = arith.constant 0 : i32
    %c0_i32_1 = arith.constant 0 : i32
    return %arg0, %c0_i32, %c0_i32_0 : i32, i32, i32
  }
  func.func @transform_1(%arg0: i32) -> (i32, i32) {
    %c0_i32 = arith.constant 0 : i32
    %c0_i32_0 = arith.constant 0 : i32
    %c0_i32_1 = arith.constant 0 : i32
    return %c0_i32, %c0_i32_0 : i32, i32
  }
  func.func @transform_2(%arg0: i32) -> (i32, i32) {
    %c0_i32 = arith.constant 0 : i32
    %c0_i32_0 = arith.constant 0 : i32
    %c0_i32_1 = arith.constant 0 : i32
    return %c0_i32, %c0_i32_0 : i32, i32
  }
  func.func @transform_3(%arg0: i32) -> (i32, i32, i32) {
    %c0_i32 = arith.constant 0 : i32
    %c0_i32_0 = arith.constant 0 : i32
    %c0_i32_1 = arith.constant 0 : i32
    return %arg0, %c0_i32, %c0_i32_0 : i32, i32, i32
  }
}

</mosaic_0001>

<bundles_post_ra>
// kernel: tpu_custom_call.1
= control target key start
LH: loop header
LB: loop body
LE: loop exit
PB: predicated region body
PF: predicated region fallthrough
CT: control target
= control target key end

     0   :  { %8 = vsyncpa [#allocation3], 0  ;;  %s2208_s0 = inlined_call_operand.hbm [shape: f32[8,16,16], index: 0, kind: input, shape index: {}]   ;;  %s2209_s1 = inlined_call_operand.hbm [shape: f32[9,32], index: 1, kind: input, shape index: {}]   ;;  %s2210_s2 = inlined_call_operand.vmem [shape: f32[1,32], index: 2, kind: input, shape index: {}]   ;;  %s2211_s3 = inlined_call_operand.hbm [shape: f32[1,2,32], index: 3, kind: output, shape index: {}]  }
   0x1   :  { %9 = vsyncpa [#allocation6], 0 }
   0x2   :  { %10 = vsyncpa [#allocation4], 0  ;;  %s1395_s12 = smov [#allocation2]  }
   0x3   :  { %s16_s13 = sshll.u32 %s1395_s12, 4  ;;  %s17_s13 = int_to_ptr.vmem [resolvable:$true] %s16_s13 }
   0x4   :  { %s1313_s14 = scalar_lea.vmem %s17_s13, 2048  ;;  %p1318_p1 = scmp.lt.s32.totalorder %s17_s13, %s17_s13 }
   0x5   :  { %p1314_p0 = scmp.ne.s32.totalorder %s17_s13, %s1313_s14  ;;  %p1319_p2 = scmp.lt.s32.totalorder %s1313_s14, %s1313_s14 }
   0x7   :  { %p1320_p3 = por %p1319_p2, %p1318_p1 }
   0x9   :  { %p1321_p4 = pnand %p1320_p3, %p1314_p0 }
   0xb   :  { %1324 = shalt.err (!%p1321_p4)
}
   0xc   :  { %s1396_s15 = smov 128   ;;  %s1397_s16 = smov 8  }
   0xd   :  { %22 = dma.hbm_to_vmem [thread:$0]  %s2208_s0, 2048, %s17_s13, [#allocation3], %s1396_s15, %s1396_s15, %s1397_s16  }
   0xe   :  { %s1398_s19 = smov [#allocation5]  }
   0xf   :  { %s28_s20 = sshll.u32 %s1398_s19, 4  ;;  %s29_s20 = int_to_ptr.vmem [resolvable:$true] %s28_s20 }
  0x10   :  { %s1333_s21 = scalar_lea.vmem %s29_s20, 256  ;;  %p1338_p6 = scmp.lt.s32.totalorder %s29_s20, %s29_s20 }
  0x11   :  { %p1334_p5 = scmp.ne.s32.totalorder %s29_s20, %s1333_s21  ;;  %p1339_p7 = scmp.lt.s32.totalorder %s1333_s21, %s1333_s21 }
  0x13   :  { %p1340_p8 = por %p1339_p7, %p1338_p6 }
  0x15   :  { %p1341_p9 = pnand %p1340_p8, %p1334_p5 }
  0x17   :  { %1344 = shalt.err (!%p1341_p9)
}
  0x18   :  { %34 = dma.hbm_to_vmem [thread:$0]  %s2209_s1, 256, %s29_s20, [#allocation6], %s1396_s15, %s1396_s15, %s1397_s16  }
  0x19   :  { %1377 = dma.done.wait [#allocation3], 2048  }
  0x1a   :  { %1378 = vsyncadd [#allocation3], 4294965248 }
  0x1b   :  { %1379 = dma.done.wait [#allocation6], 256  }
  0x1c   :  { %1380 = vsyncadd [#allocation6], 4294967040  ;;  %v1426_v0 = vld [vmem:[#allocation5] ss:$0 sm:$0xff]  ;;  %v1428_v1 = vld [vmem:[#allocation5 + $0x1] ss:$0 sm:$0xff] }
  0x1d   :  { %2214 = vst [vmem:[#allocation11_spill] sm:$0xff] %v1426_v0  ;;  %v1430_v2 = vld [vmem:[#allocation5 + $0x2] ss:$0 sm:$0xff]  ;;  %v1432_v3 = vld [vmem:[#allocation5 + $0x3] ss:$0 sm:$0xff]  ;;  %v1449_v10 = vmov 0.0  }
  0x1e   :  { %v1434_v4 = vld [vmem:[#allocation5 + $0x4] ss:$0 sm:$0xff]  ;;  %v1436_v5 = vld [vmem:[#allocation5 + $0x5] ss:$0 sm:$0xff]  ;;  %v1438_v6 = vld [vmem:[#allocation5 + $0x6] ss:$0 sm:$0xff] }
  0x1f   :  { %v1440_v7 = vld [vmem:[#allocation5 + $0x7] ss:$0 sm:$0xff]  ;;  %v1442_v8 = vld [vmem:[#allocation5 + $0x8] ss:$0 sm:$0xff]  ;;  %v1447_v9 = vld [vmem:[%s2210_s2] ss:$0 sm:$0xff] }
  0x20   :  { %v1451_v11 = vmov 0.0   ;;  %s1453_s24 = smov 0  }
  0x21 LB: > { %2216 = vst [vmem:[#allocation12_spill] sm:$0xff] %v1385_v10  ;;  %2217 = vst [vmem:[#allocation13_spill] sm:$0xff] %v1389_v11  ;;  %v66_v12 = vlaneseq  ;;  %s1265_s2 = sshll.u32 %s1393_s24, 4  ;;  %vm1076_vm0 = vcmask 261120   ;;  %vm1078_vm1 = vcmask 259072   ;;  %p1073_p10 = scmp.lt.s32.totalorder %s1393_s24, 8  ;;  %v1385_v10 = vphi %v1449_v10, %v2257_v10   ;;  %s1393_s24 = sphi %s1453_s24, %s59_s24   ;;  %v1389_v11 = vphi %v1451_v11, %v2258_v11  }
  0x22   : > { %s63_s25 = scalar_lea.vmem [#allocation2], %s1265_s2  ;;  %s59_s24 = sadd.s32 1, %s1393_s24  }
  0x23   : > { %v67_v13 = vshrl.u32 %v66_v12, 7  ;;  %v64_v14 = vld [vmem:[%s63_s25] sm:$0xff]  ;;  %v65_v21 = vld [vmem:[%s63_s25 + $0x8] sm:$0xff]  ;;  %s1074_s26 = scalar_select %p1073_p10, 1, 0 }
  0x24   : > { %v2215_v0 = vld [vmem:[#allocation11_spill] sm:$0xff]  ;;  %p56_p11 = scmp.ge.s32.totalorder %s59_s24, 8  }
  0x25   : > { %v79_v15 = vsub.s32 1, %v67_v13  ;;  %v68_v16 = vsub.s32 0, %v67_v13  ;;  %v101_v19 = vsub.s32 3, %v67_v13  ;;  %v90_v20 = vsub.s32 2, %v67_v13  ;;  %s1075_s27 = scvt.s32.f32 %s1074_s26  ;;  %s1399_s28 = smov (%p56_p11), [#allocation7]  }
  0x26   : > { %v112_v25 = vsub.s32 4, %v67_v13  ;;  %v123_v28 = vsub.s32 5, %v67_v13  ;;  %v134_v30 = vsub.s32 6, %v67_v13  ;;  %v145_v32 = vsub.s32 7, %v67_v13  ;;  %s1242_s29 = sshll.u32 (%p56_p11), %s1399_s28, 4  ;;  %s1243_s29 = int_to_ptr.vmem [resolvable:$true] %s1242_s29 }
  0x27   : > { %v80_v17 = vrot.slane %v64_v14, %v79_v15  ;;  %v69_v18 = vrot.slane %v64_v14, %v68_v16  ;;  %v1465_v22 = vrot.slane %v65_v21, %v101_v19  ;;  %v91_v23 = vrot.slane %v64_v14, %v90_v20  ;;  %s1345_s30 = scalar_lea.vmem (%p56_p11), %s1243_s29, 32  ;;  %p1350_p13 = scmp.lt.s32.totalorder (%p56_p11), %s1243_s29, %s1243_s29 }
  0x28   : > { %v102_v24 = vrot.slane %v64_v14, %v101_v19  ;;  %v1467_v26 = vrot.slane %v65_v21, %v112_v25  ;;  %v113_v27 = vrot.slane %v64_v14, %v112_v25  ;;  %v124_v29 = vrot.slane %v64_v14, %v123_v28  ;;  %p1346_p12 = scmp.ne.s32.totalorder (%p56_p11), %s1243_s29, %s1345_s30  ;;  %p1351_p0 = scmp.lt.s32.totalorder (%p56_p11), %s1345_s30, %s1345_s30 }
  0x29   : > { %82 = vbcast.lane.b32.xlu1 %v80_v17, 256  ;;  %71 = vbcast.lane.b32.xlu0 %v69_v18, 256  ;;  %v135_v31 = vrot.slane %v64_v14, %v134_v30  ;;  %v1469_v33 = vrot.slane %v65_v21, %v123_v28  ;;  %v146_v34 = vrot.slane %v64_v14, %v145_v32  ;;  %vm1233_vm2 = vcmask (%p56_p11), 253952  }
  0x2a   : > { %v157_v35 = vrot.slane %v65_v21, %v68_v16  ;;  %v168_v36 = vrot.slane %v65_v21, %v79_v15  ;;  %v179_v37 = vrot.slane %v65_v21, %v90_v20  ;;  %v1471_v38 = vrot.slane %v65_v21, %v134_v30  ;;  %p1352_p1 = por (%p56_p11), %p1351_p0, %p1350_p13 }
  0x2b   : > { %v1473_v39 = vrot.slane %v65_v21, %v145_v32 }
  0x2c   :  { %p1353_p2 = pnand (%p56_p11), %p1352_p1, %p1346_p12 }
  0x2d   : > { %86 = vbcast.lane.b32.xlu1 %v80_v17, 264  ;;  %75 = vbcast.lane.b32.xlu0 %v69_v18, 264 }
  0x31   : > { %97 = vbcast.lane.b32.xlu1 %v91_v23, 264  ;;  %93 = vbcast.lane.b32.xlu0 %v91_v23, 256 }
  0x35   : > { %108 = vbcast.lane.b32.xlu1 %v102_v24, 264  ;;  %104 = vbcast.lane.b32.xlu0 %v102_v24, 256 }
  0x39   : > { %119 = vbcast.lane.b32.xlu1 %v113_v27, 264  ;;  %115 = vbcast.lane.b32.xlu0 %v113_v27, 256 }
  0x3d   : > { %130 = vbcast.lane.b32.xlu1 %v124_v29, 264  ;;  %126 = vbcast.lane.b32.xlu0 %v124_v29, 256 }
  0x41   : > { %141 = vbcast.lane.b32.xlu1 %v135_v31, 264  ;;  %137 = vbcast.lane.b32.xlu0 %v135_v31, 256 }
  0x45   : > { %152 = vbcast.lane.b32.xlu1 %v146_v34, 264  ;;  %148 = vbcast.lane.b32.xlu0 %v146_v34, 256 }
  0x49   : > { %163 = vbcast.lane.b32.xlu1 %v157_v35, 264  ;;  %159 = vbcast.lane.b32.xlu0 %v157_v35, 256 }
  0x4d   : > { %174 = vbcast.lane.b32.xlu1 %v168_v36, 264  ;;  %170 = vbcast.lane.b32.xlu0 %v168_v36, 256 }
  0x51   : > { %185 = vbcast.lane.b32.xlu1 %v179_v37, 264  ;;  %181 = vbcast.lane.b32.xlu0 %v179_v37, 256 }
  0x55   : > { %286 = vbcast.lane.b32.xlu1 %v69_v18, 265  ;;  %282 = vbcast.lane.b32.xlu0 %v69_v18, 257 }
  0x59   : > { %454 = vbcast.lane.b32.xlu1 %v69_v18, 258  ;;  %290 = vbcast.lane.b32.xlu0 %v80_v17, 257 }
  0x5d   : > { %294 = vbcast.lane.b32.xlu1 %v80_v17, 265  ;;  %458 = vbcast.lane.b32.xlu0 %v69_v18, 266 }
  0x61   : > { %298 = vbcast.lane.b32.xlu1 %v91_v23, 257  ;;  %462 = vbcast.lane.b32.xlu0 %v80_v17, 258 }
  0x65   : > { %302 = vbcast.lane.b32.xlu1 %v91_v23, 265  ;;  %466 = vbcast.lane.b32.xlu0 %v80_v17, 266 }
  0x69   : > { %306 = vbcast.lane.b32.xlu1 %v102_v24, 257  ;;  %470 = vbcast.lane.b32.xlu0 %v91_v23, 258 }
  0x6d   : > { %310 = vbcast.lane.b32.xlu1 %v102_v24, 265  ;;  %474 = vbcast.lane.b32.xlu0 %v91_v23, 266 }
  0x71   : > { %314 = vbcast.lane.b32.xlu1 %v113_v27, 257  ;;  %478 = vbcast.lane.b32.xlu0 %v102_v24, 258 }
  0x75   : > { %318 = vbcast.lane.b32.xlu1 %v113_v27, 265  ;;  %482 = vbcast.lane.b32.xlu0 %v102_v24, 266 }
  0x79   : > { %322 = vbcast.lane.b32.xlu1 %v124_v29, 257  ;;  %486 = vbcast.lane.b32.xlu0 %v113_v27, 258 }
  0x7d   : > { %326 = vbcast.lane.b32.xlu1 %v124_v29, 265  ;;  %490 = vbcast.lane.b32.xlu0 %v113_v27, 266 }
  0x81   : > { %330 = vbcast.lane.b32.xlu1 %v135_v31, 257  ;;  %494 = vbcast.lane.b32.xlu0 %v124_v29, 258 }
  0x85   : > { %334 = vbcast.lane.b32.xlu1 %v135_v31, 265  ;;  %498 = vbcast.lane.b32.xlu0 %v124_v29, 266 }
  0x89   : > { %338 = vbcast.lane.b32.xlu1 %v146_v34, 257  ;;  %502 = vbcast.lane.b32.xlu0 %v135_v31, 258 }
  0x8d   : > { %342 = vbcast.lane.b32.xlu1 %v146_v34, 265  ;;  %506 = vbcast.lane.b32.xlu0 %v135_v31, 266 }
  0x91   : > { %346 = vbcast.lane.b32.xlu1 %v157_v35, 257  ;;  %510 = vbcast.lane.b32.xlu0 %v146_v34, 258 }
  0x95   : > { %350 = vbcast.lane.b32.xlu1 %v157_v35, 265  ;;  %514 = vbcast.lane.b32.xlu0 %v146_v34, 266 }
  0x99   : > { %354 = vbcast.lane.b32.xlu1 %v168_v36, 257  ;;  %518 = vbcast.lane.b32.xlu0 %v157_v35, 258 }
  0x9b   : > { %v83_v40 = vpop.permute.xlu1 %82  ;;  %v72_v41 = vpop.permute.xlu0 %71 }
  0x9c   : > { %v226_v60 = vmul.f32 %v2215_v0, %v83_v40  ;;  %v639_v61 = vmul.f32 %v1432_v3, %v83_v40  ;;  %v224_v12 = vmul.f32 %v2215_v0, %v72_v41 }
  0x9d   : > { %358 = vbcast.lane.b32.xlu1 %v168_v36, 265  ;;  %522 = vbcast.lane.b32.xlu0 %v157_v35, 266 }
  0x9f   : > { %v87_v42 = vpop.permute.xlu1 %86  ;;  %v76_v43 = vpop.permute.xlu0 %75 }
  0xa0   : > { %v1511_v13 = vmul.f32 %v2215_v0, %v87_v42  ;;  %v1514_v14 = vmul.f32 %v1432_v3, %v87_v42  ;;  %v225_v15 = vmul.f32 %v2215_v0, %v76_v43 }
  0xa1   : > { %362 = vbcast.lane.b32.xlu1 %v179_v37, 257  ;;  %526 = vbcast.lane.b32.xlu0 %v168_v36, 258 }
  0xa3   : > { %v98_v44 = vpop.permute.xlu1 %97  ;;  %v94_v45 = vpop.permute.xlu0 %93 }
  0xa4   : > { %v1518_v16 = vmul.f32 %v2215_v0, %v98_v44  ;;  %v1521_v17 = vmul.f32 %v1432_v3, %v98_v44  ;;  %v1524_v18 = vmul.f32 %v1438_v6, %v98_v44  ;;  %v1529_v19 = vmul.f32 %v2215_v0, %v94_v45 }
  0xa5   : > { %366 = vbcast.lane.b32.xlu1 %v179_v37, 265  ;;  %530 = vbcast.lane.b32.xlu0 %v168_v36, 266  ;;  %v1532_v20 = vmul.f32 %v1432_v3, %v94_v45  ;;  %v1535_v21 = vmul.f32 %v1438_v6, %v94_v45 }
  0xa7   : > { %v109_v46 = vpop.permute.xlu1 %108  ;;  %v105_v47 = vpop.permute.xlu0 %104 }
  0xa8   : > { %v1541_v23 = vmul.f32 %v1432_v3, %v109_v46  ;;  %v1544_v24 = vmul.f32 %v1438_v6, %v109_v46  ;;  %v1547_v25 = vmul.f32 %v2215_v0, %v105_v47  ;;  %v1553_v29 = vmul.f32 %v1438_v6, %v105_v47 }
  0xa9   : > { %192 = vbcast.lane.b32.xlu1 %v1465_v22, 256  ;;  %534 = vbcast.lane.b32.xlu0 %v179_v37, 258 }
  0xab   : > { %v120_v48 = vpop.permute.xlu1 %119  ;;  %v116_v49 = vpop.permute.xlu0 %115 }
  0xac   : > { %v1556_v30 = vmul.f32 %v2215_v0, %v120_v48  ;;  %v1561_v34 = vmul.f32 %v1432_v3, %v120_v48  ;;  %v1564_v35 = vmul.f32 %v1438_v6, %v120_v48  ;;  %v1567_v36 = vmul.f32 %v2215_v0, %v116_v49 }
  0xad   : > { %538 = vbcast.lane.b32.xlu1 %v179_v37, 266  ;;  %370 = vbcast.lane.b32.xlu0 %v1465_v22, 257  ;;  %v1572_v37 = vmul.f32 %v1432_v3, %v116_v49  ;;  %v1575_v40 = vmul.f32 %v1438_v6, %v116_v49 }
  0xaf   : > { %v131_v50 = vpop.permute.xlu1 %130  ;;  %v127_v51 = vpop.permute.xlu0 %126 }
  0xb0   : > { %v1578_v43 = vmul.f32 %v2215_v0, %v131_v50  ;;  %v1581_v44 = vmul.f32 %v1432_v3, %v131_v50  ;;  %v1584_v45 = vmul.f32 %v1438_v6, %v131_v50  ;;  %v1593_v49 = vmul.f32 %v1438_v6, %v127_v51 }
  0xb1   : > { %374 = vbcast.lane.b32.xlu1 %v1465_v22, 265  ;;  %196 = vbcast.lane.b32.xlu0 %v1465_v22, 264 }
  0xb3   : > { %v1479_v52 = vpop.permute.xlu1 %141  ;;  %v1481_v53 = vpop.permute.xlu0 %137 }
  0xb4   : > { %v1603_v50 = vmul.f32 %v1432_v3, %v1479_v52  ;;  %v1621_v11 = vmul.f32 %v1438_v6, %v1481_v53 }
  0xb5   : > { %203 = vbcast.lane.b32.xlu1 %v1467_v26, 256  ;;  %542 = vbcast.lane.b32.xlu0 %v1465_v22, 258 }
  0xb6   : > { %2219 = vst [vmem:[#allocation15_spill] sm:$0xff] %v1603_v50 }
  0xb7   : > { %v1485_v54 = vpop.permute.xlu1 %152  ;;  %v1487_v55 = vpop.permute.xlu0 %148 }
  0xb9   : > { %546 = vbcast.lane.b32.xlu1 %v1465_v22, 266  ;;  %378 = vbcast.lane.b32.xlu0 %v1467_v26, 257  ;;  %v1538_v22 = vmul.f32 %v2215_v0, %v109_v46  ;;  %v1587_v46 = vmul.f32 %v2215_v0, %v127_v51 }
  0xbb   : > { %v1491_v56 = vpop.permute.xlu1 %163  ;;  %v1493_v57 = vpop.permute.xlu0 %159 }
  0xbd   : > { %382 = vbcast.lane.b32.xlu1 %v1467_v26, 265  ;;  %207 = vbcast.lane.b32.xlu0 %v1467_v26, 264 }
  0xbf   : > { %v1497_v58 = vpop.permute.xlu1 %174  ;;  %v1499_v59 = vpop.permute.xlu0 %170 }
  0xc1   : > { %214 = vbcast.lane.b32.xlu1 %v1469_v33, 256  ;;  %550 = vbcast.lane.b32.xlu0 %v1467_v26, 258 }
  0xc3   : > { %v1505_v62 = vpop.permute.xlu1 %185  ;;  %v1507_v63 = vpop.permute.xlu0 %181 }
  0xc5   : > { %554 = vbcast.lane.b32.xlu1 %v1467_v26, 266  ;;  %386 = vbcast.lane.b32.xlu0 %v1469_v33, 257  ;;  %v1550_v26 = vmul.f32 %v1432_v3, %v105_v47 }
  0xc7   : > { %v287_v27 = vpop.permute.xlu1 %286  ;;  %v283_v28 = vpop.permute.xlu0 %282 }
  0xc8   : > { %v397_v31 = vmul.f32 %v1428_v1, %v287_v27  ;;  %v396_v32 = vmul.f32 %v1428_v1, %v283_v28  ;;  %v1590_v27 = vmul.f32 %v1432_v3, %v127_v51  ;;  %v1599_v28 = vmul.f32 %v2215_v0, %v1479_v52 }
  0xc9   : > { %390 = vbcast.lane.b32.xlu1 %v1469_v33, 265  ;;  %218 = vbcast.lane.b32.xlu0 %v1469_v33, 264  ;;  %v1613_v51 = vmul.f32 %v2215_v0, %v1481_v53 }
  0xca   : > { %v425_v41 = vadd.f32 %v397_v31, %v225_v15  ;;  %v424_v42 = vadd.f32 %v396_v32, %v224_v12  ;;  %2218 = vst [vmem:[#allocation14_spill] sm:$0xff] %v1599_v28  ;;  %v1607_v31 = vmul.f32 %v1438_v6, %v1479_v52  ;;  %v1617_v32 = vmul.f32 %v1432_v3, %v1481_v53 }
  0xcb   : > { %v455_v47 = vpop.permute.xlu1 %454  ;;  %v291_v48 = vpop.permute.xlu0 %290  ;;  %v1625_v52 = vmul.f32 %v2215_v0, %v1485_v54 }
  0xcc   : > { %v568_v12 = vmul.f32 %v1430_v2, %v455_v47  ;;  %v398_v15 = vmul.f32 %v1428_v1, %v291_v48  ;;  %2220 = vst [vmem:[#allocation16_spill] sm:$0xff] %v1607_v31  ;;  %v1633_v31 = vmul.f32 %v1438_v6, %v1485_v54 }
  0xcd   : > { %562 = vbcast.lane.b32.xlu1 %v1469_v33, 266  ;;  %558 = vbcast.lane.b32.xlu0 %v1469_v33, 258  ;;  %2221 = vst [vmem:[#allocation17_spill] sm:$0xff] %v1625_v52  ;;  %v1629_v33 = vmul.f32 %v1432_v3, %v1485_v54  ;;  %v1648_v54 = vmul.f32 %v1438_v6, %v1487_v55 }
  0xce   : > { %v596_v47 = vadd.f32 %v568_v12, %v424_v42  ;;  %v426_v10 = vadd.f32 %v398_v15, %v226_v60  ;;  %2223 = vst [vmem:[#allocation19_spill] sm:$0xff] %v1633_v31  ;;  %v707_v60 = vmul.f32 %v1434_v4, %v291_v48  ;;  %v1640_v15 = vmul.f32 %v2215_v0, %v1487_v55 }
  0xcf   : > { %2222 = vst [vmem:[#allocation18_spill] sm:$0xff] %v1629_v33  ;;  %v295_v50 = vpop.permute.xlu1 %294  ;;  %v459_v28 = vpop.permute.xlu0 %458  ;;  %v1644_v33 = vmul.f32 %v1432_v3, %v1487_v55  ;;  %2224 = vst [vmem:[#allocation20_spill] sm:$0xff] %v1648_v54  ;;  %v1659_v31 = vmul.f32 %v1432_v3, %v1491_v56  ;;  %v1663_v55 = vmul.f32 %v1438_v6, %v1491_v56 }
  0xd0   : > { %v667_v42 = vadd.f32 %v639_v61, %v596_v47  ;;  %v399_v53 = vmul.f32 %v1428_v1, %v295_v50  ;;  %v569_v12 = vmul.f32 %v1430_v2, %v459_v28  ;;  %v1654_v61 = vmul.f32 %v2215_v0, %v1491_v56 }
  0xd1   : > { %633 = vbcast.lane.b32.xlu1 %v1471_v38, 264  ;;  %629 = vbcast.lane.b32.xlu0 %v1471_v38, 256  ;;  %2226 = vst [vmem:[#allocation22_spill] sm:$0xff] %v1659_v31  ;;  %2227 = vst [vmem:[#allocation23_spill] sm:$0xff] %v1663_v55  ;;  %v1667_v54 = vmul.f32 %v2215_v0, %v1493_v57  ;;  %v1671_v52 = vmul.f32 %v1432_v3, %v1493_v57 }
  0xd2   : > { %2225 = vst [vmem:[#allocation21_spill] sm:$0xff] %v1654_v61  ;;  %v735_v48 = vadd.f32 %v707_v60, %v667_v42  ;;  %v427_v28 = vadd.f32 %v399_v53, %v1511_v13  ;;  %v597_v47 = vadd.f32 %v569_v12, %v425_v41  ;;  %v1675_v13 = vmul.f32 %v1438_v6, %v1493_v57 }
  0xd3   : > { %2228 = vst [vmem:[#allocation24_spill] sm:$0xff] %v1667_v54  ;;  %2229 = vst [vmem:[#allocation25_spill] sm:$0xff] %v1671_v52  ;;  %v299_v42 = vpop.permute.xlu1 %298  ;;  %v463_v60 = vpop.permute.xlu0 %462  ;;  %v708_v41 = vmul.f32 %v1434_v4, %v295_v50  ;;  %v1682_v12 = vmul.f32 %v2215_v0, %v1497_v58  ;;  %v1690_v57 = vmul.f32 %v1432_v3, %v1497_v58 }
  0xd4   : > { %2230 = vst [vmem:[#allocation26_spill] sm:$0xff] %v1675_v13  ;;  %v668_v53 = vadd.f32 %v1514_v14, %v597_v47  ;;  %v400_v56 = vmul.f32 %v1428_v1, %v299_v42  ;;  %v570_v55 = vmul.f32 %v1430_v2, %v463_v60  ;;  %v775_v31 = vmul.f32 %v1436_v5, %v463_v60 }
  0xd5   : > { %2231 = vst [vmem:[#allocation27_spill] sm:$0xff] %v1682_v12  ;;  %701 = vbcast.lane.b32.xlu1 %v1471_v38, 265  ;;  %697 = vbcast.lane.b32.xlu0 %v1471_v38, 257  ;;  %2232 = vst [vmem:[#allocation28_spill] sm:$0xff] %v1690_v57  ;;  %v1694_v14 = vmul.f32 %v1438_v6, %v1497_v58  ;;  %v1699_v12 = vmul.f32 %v2215_v0, %v1499_v59 }
  0xd6   : > { %v428_v50 = vadd.f32 %v400_v56, %v1529_v19  ;;  %v736_v47 = vadd.f32 %v708_v41, %v668_v53  ;;  %v1703_v60 = vmul.f32 %v1432_v3, %v1499_v59  ;;  %v598_v13 = vadd.f32 %v570_v55, %v426_v10 }
  0xd7   : > { %2233 = vst [vmem:[#allocation29_spill] sm:$0xff] %v1694_v14  ;;  %v803_v61 = vadd.f32 %v775_v31, %v735_v48  ;;  %v303_v52 = vpop.permute.xlu1 %302  ;;  %v467_v54 = vpop.permute.xlu0 %466  ;;  %v709_v57 = vmul.f32 %v1434_v4, %v299_v42  ;;  %v914_v58 = vmul.f32 %v1440_v7, %v299_v42  ;;  %v1716_v10 = vmul.f32 %v1438_v6, %v1499_v59 }
  0xd8   : > { %v401_v14 = vmul.f32 %v1428_v1, %v303_v52  ;;  %v571_v19 = vmul.f32 %v1430_v2, %v467_v54  ;;  %v669_v41 = vadd.f32 %v1532_v20, %v598_v13  ;;  %v776_v56 = vmul.f32 %v1436_v5, %v467_v54 }
  0xd9   : > { %v874_v53 = vadd.f32 %v1535_v21, %v803_v61  ;;  %769 = vbcast.lane.b32.xlu1 %v1471_v38, 266  ;;  %765 = vbcast.lane.b32.xlu0 %v1471_v38, 258  ;;  %2234 = vst [vmem:[#allocation30_spill] sm:$0xff] %v1716_v10  ;;  %v1720_v31 = vmul.f32 %v2215_v0, %v1505_v62 }
  0xda   : > { %v429_v48 = vadd.f32 %v401_v14, %v1518_v16  ;;  %v599_v55 = vadd.f32 %v571_v19, %v427_v28  ;;  %v1725_v20 = vmul.f32 %v1432_v3, %v1505_v62  ;;  %v804_v21 = vadd.f32 %v776_v56, %v736_v47 }
  0xdb   : > { %2235 = vst [vmem:[#allocation31_spill] sm:$0xff] %v1720_v31  ;;  %v307_v54 = vpop.permute.xlu1 %306  ;;  %v737_v61 = vadd.f32 %v709_v57, %v669_v41  ;;  %v942_v38 = vadd.f32 %v914_v58, %v874_v53  ;;  %v471_v42 = vpop.permute.xlu0 %470  ;;  %v710_v59 = vmul.f32 %v1434_v4, %v303_v52  ;;  %v915_v13 = vmul.f32 %v1440_v7, %v303_v52 }
  0xdc   : > { %v670_v10 = vadd.f32 %v1521_v17, %v599_v55  ;;  %v402_v31 = vmul.f32 %v1428_v1, %v307_v54  ;;  %v875_v16 = vadd.f32 %v1524_v18, %v804_v21  ;;  %v572_v28 = vmul.f32 %v1430_v2, %v471_v42 }
  0xdd   : > { %v777_v14 = vmul.f32 %v1436_v5, %v471_v42  ;;  %v982_v47 = vmul.f32 %v1442_v8, %v471_v42  ;;  %840 = vbcast.lane.b32.xlu1 %v1473_v39, 264  ;;  %v1738_v57 = vmul.f32 %v1438_v6, %v1505_v62  ;;  %v1742_v17 = vmul.f32 %v2215_v0, %v1507_v63 }
  0xde   : > { %v430_v52 = vadd.f32 %v402_v31, %v1547_v25  ;;  %836 = vbcast.lane.b32.xlu0 %v1473_v39, 256  ;;  %v738_v18 = vadd.f32 %v710_v59, %v670_v10  ;;  %v600_v58 = vadd.f32 %v572_v28, %v428_v50  ;;  %v943_v56 = vadd.f32 %v915_v13, %v875_v16 }
  0xdf   : > { %v805_v19 = vadd.f32 %v777_v14, %v737_v61  ;;  %v1010_v41 = vadd.f32 %v982_v47, %v942_v38  ;;  %v311_v53 = vpop.permute.xlu1 %310  ;;  %v475_v55 = vpop.permute.xlu0 %474  ;;  %v1748_v21 = vmul.f32 %v1432_v3, %v1507_v63  ;;  %v711_v62 = vmul.f32 %v1434_v4, %v307_v54 }
  0xe0   : > { %v403_v42 = vmul.f32 %v1428_v1, %v311_v53  ;;  %v573_v0 = vmul.f32 %v1430_v2, %v475_v55  ;;  %v671_v25 = vadd.f32 %v1550_v26, %v600_v58  ;;  %v778_v31 = vmul.f32 %v1436_v5, %v475_v55 }
  0xe1   : > { %v876_v10 = vadd.f32 %v1553_v29, %v805_v19  ;;  %v1044_v50 = vadd.f32 %v1447_v9, %v1010_v41  ;;  %908 = vbcast.lane.b32.xlu1 %v1473_v39, 265  ;;  %v1760_v61 = vmul.f32 %v1438_v6, %v1507_v63  ;;  %v983_v13 = vmul.f32 %v1442_v8, %v475_v55 }
  0xe2   : > { %v431_v38 = vadd.f32 %v403_v42, %v1538_v22  ;;  %v601_v59 = vadd.f32 %v573_v0, %v429_v48  ;;  %904 = vbcast.lane.b32.xlu0 %v1473_v39, 257  ;;  %v916_v26 = vmul.f32 %v1440_v7, %v307_v54  ;;  %v712_v29 = vmul.f32 %v1434_v4, %v311_v53 }
  0xe3   : > { %v806_v16 = vadd.f32 %v778_v31, %v738_v18  ;;  %v315_v28 = vpop.permute.xlu1 %314  ;;  %v739_v14 = vadd.f32 %v711_v62, %v671_v25  ;;  %v479_v47 = vpop.permute.xlu0 %478  ;;  %v917_v58 = vmul.f32 %v1440_v7, %v311_v53  ;;  %v1011_v19 = vadd.f32 %v983_v13, %v943_v56 }
  0xe4   : > { %v672_v63 = vadd.f32 %v1541_v23, %v601_v59  ;;  %v404_v22 = vmul.f32 %v1428_v1, %v315_v28  ;;  %v1077_v0 = vsel %vm1076_vm0, %v1044_v50, 0.0  ;;  %v1142_v48 = vmul.f32 %v1044_v50, %v1044_v50 }
  0xe5   : > { %v877_v41 = vadd.f32 %v1544_v24, %v806_v16  ;;  %v944_v55 = vadd.f32 %v916_v26, %v876_v10  ;;  %976 = vbcast.lane.b32.xlu1 %v1473_v39, 266  ;;  %v1045_v54 = vadd.f32 %v1447_v9, %v1011_v19  ;;  %v574_v62 = vmul.f32 %v1430_v2, %v479_v47 }
  0xe6   : > { %v432_v18 = vadd.f32 %v404_v22, %v1567_v36  ;;  %v779_v53 = vmul.f32 %v1436_v5, %v479_v47  ;;  %972 = vbcast.lane.b32.xlu0 %v1473_v39, 258  ;;  %v713_v23 = vmul.f32 %v1434_v4, %v315_v28  ;;  %v984_v56 = vmul.f32 %v1442_v8, %v479_v47 }
  0xe7   : > { %v319_v42 = vpop.permute.xlu1 %318  ;;  %v740_v25 = vadd.f32 %v712_v29, %v672_v63  ;;  %v945_v24 = vadd.f32 %v917_v58, %v877_v41  ;;  %v483_v10 = vpop.permute.xlu0 %482  ;;  %v1079_v50 = vsel %vm1078_vm1, %v1045_v54, 0.0  ;;  %v1143_v31 = vmul.f32 %v1045_v54, %v1045_v54 }
  0xe8   : > { %v602_v59 = vadd.f32 %v574_v62, %v430_v52  ;;  %v807_v13 = vadd.f32 %v779_v53, %v739_v14  ;;  %v1170_v36 = vsel %vm1076_vm0, %v1142_v48, 0.0  ;;  %v1080_v26 = vadd.f32 %v1079_v50, %v1077_v0 }
  0xe9   : > { %v1012_v16 = vadd.f32 %v984_v56, %v944_v55  ;;  %v405_v19 = vmul.f32 %v1428_v1, %v319_v42  ;;  %v1171_v39 = vsel %vm1078_vm1, %v1143_v31, 0.0  ;;  %v918_v22 = vmul.f32 %v1440_v7, %v315_v28 }
  0xea   : > { %v673_v47 = vadd.f32 %v1572_v37, %v602_v59  ;;  %v878_v29 = vadd.f32 %v1575_v40, %v807_v13  ;;  %v1172_v58 = vadd.f32 %v1171_v39, %v1170_v36  ;;  %v714_v52 = vmul.f32 %v1434_v4, %v319_v42 }
  0xeb   : > { %v1046_v63 = vadd.f32 %v1447_v9, %v1012_v16  ;;  %v575_v14 = vmul.f32 %v1430_v2, %v483_v10  ;;  %v323_v48 = vpop.permute.xlu1 %322  ;;  %v487_v0 = vpop.permute.xlu0 %486  ;;  %v433_v41 = vadd.f32 %v405_v19, %v1556_v30  ;;  %v919_v55 = vmul.f32 %v1440_v7, %v319_v42 }
  0xec   : > { %v780_v54 = vmul.f32 %v1436_v5, %v483_v10  ;;  %v985_v28 = vmul.f32 %v1442_v8, %v483_v10  ;;  %v406_v53 = vmul.f32 %v1428_v1, %v323_v48  ;;  %v715_v59 = vmul.f32 %v1434_v4, %v323_v48 }
  0xed   : > { %v1081_v37 = vsel %vm1076_vm0, %v1046_v63, 0.0  ;;  %v1144_v40 = vmul.f32 %v1046_v63, %v1046_v63  ;;  %v603_v62 = vadd.f32 %v575_v14, %v431_v38  ;;  %v741_v42 = vadd.f32 %v713_v23, %v673_v47 }
  0xee   : > { %v1082_v56 = vadd.f32 %v1081_v37, %v1080_v26  ;;  %v808_v50 = vadd.f32 %v780_v54, %v740_v25  ;;  %v1013_v31 = vadd.f32 %v985_v28, %v945_v24  ;;  %v946_v36 = vadd.f32 %v918_v22, %v878_v29 }
  0xef   : > { %v1173_v13 = vsel %vm1076_vm0, %v1144_v40, 0.0  ;;  %v674_v30 = vadd.f32 %v1561_v34, %v603_v62  ;;  %v327_v16 = vpop.permute.xlu1 %326  ;;  %v491_v19 = vpop.permute.xlu0 %490  ;;  %v576_v63 = vmul.f32 %v1430_v2, %v487_v0  ;;  %v434_v25 = vadd.f32 %v406_v53, %v1587_v46 }
  0xf0   : > { %v1174_v10 = vadd.f32 %v1173_v13, %v1172_v58  ;;  %v879_v39 = vadd.f32 %v1564_v35, %v808_v50  ;;  %v1047_v38 = vadd.f32 %v1447_v9, %v1013_v31  ;;  %v920_v24 = vmul.f32 %v1440_v7, %v323_v48 }
  0xf1   : > { %v781_v26 = vmul.f32 %v1436_v5, %v487_v0  ;;  %v986_v14 = vmul.f32 %v1442_v8, %v487_v0  ;;  %v604_v22 = vadd.f32 %v576_v63, %v432_v18  ;;  %v407_v47 = vmul.f32 %v1428_v1, %v327_v16 }
  0xf2   : > { %v1083_v34 = vsel %vm1078_vm1, %v1047_v38, 0.0  ;;  %v1145_v23 = vmul.f32 %v1047_v38, %v1047_v38  ;;  %v716_v54 = vmul.f32 %v1434_v4, %v327_v16  ;;  %v742_v40 = vadd.f32 %v714_v52, %v674_v30 }
  0xf3   : > { %v1084_v29 = vadd.f32 %v1083_v34, %v1082_v56  ;;  %v809_v35 = vadd.f32 %v781_v26, %v741_v42  ;;  %v1014_v58 = vadd.f32 %v986_v14, %v946_v36  ;;  %v331_v28 = vpop.permute.xlu1 %330  ;;  %v495_v37 = vpop.permute.xlu0 %494  ;;  %v675_v48 = vadd.f32 %v1590_v27, %v604_v22 }
  0xf4   : > { %v1175_v46 = vsel %vm1078_vm1, %v1145_v23, 0.0  ;;  %v947_v62 = vadd.f32 %v919_v55, %v879_v39  ;;  %v577_v50 = vmul.f32 %v1430_v2, %v491_v19  ;;  %v435_v56 = vadd.f32 %v407_v47, %v1578_v43 }
  0xf5   : > { %v1176_v0 = vadd.f32 %v1175_v46, %v1174_v10  ;;  %v880_v53 = vadd.f32 %v1593_v49, %v809_v35  ;;  %v1048_v18 = vadd.f32 %v1447_v9, %v1014_v58  ;;  %v921_v31 = vmul.f32 %v1440_v7, %v327_v16 }
  0xf6   : > { %v782_v13 = vmul.f32 %v1436_v5, %v491_v19  ;;  %v987_v42 = vmul.f32 %v1442_v8, %v491_v19  ;;  %v605_v52 = vadd.f32 %v577_v50, %v433_v41  ;;  %v408_v55 = vmul.f32 %v1428_v1, %v331_v28 }
  0xf7   : > { %v1085_v36 = vsel %vm1076_vm0, %v1048_v18, 0.0  ;;  %v1146_v27 = vmul.f32 %v1048_v18, %v1048_v18  ;;  %v335_v30 = vpop.permute.xlu1 %334  ;;  %v499_v49 = vpop.permute.xlu0 %498  ;;  %v717_v63 = vmul.f32 %v1434_v4, %v331_v28  ;;  %v922_v26 = vmul.f32 %v1440_v7, %v331_v28 }
  0xf8   : > { %v1086_v10 = vadd.f32 %v1085_v36, %v1084_v29  ;;  %v810_v39 = vadd.f32 %v782_v13, %v742_v40  ;;  %v1015_v38 = vadd.f32 %v987_v42, %v947_v62  ;;  %v676_v16 = vadd.f32 %v1581_v44, %v605_v52 }
  0xf9   : > { %v1177_v43 = vsel %vm1076_vm0, %v1146_v27, 0.0  ;;  %v948_v19 = vadd.f32 %v920_v24, %v880_v53  ;;  %v578_v23 = vmul.f32 %v1430_v2, %v495_v37  ;;  %v743_v22 = vadd.f32 %v715_v59, %v675_v48 }
  0xfa   : > { %v1178_v14 = vadd.f32 %v1177_v43, %v1176_v0  ;;  %v881_v34 = vadd.f32 %v1584_v45, %v810_v39  ;;  %v1049_v41 = vadd.f32 %v1447_v9, %v1015_v38  ;;  %v783_v47 = vmul.f32 %v1436_v5, %v495_v37 }
  0xfb   : > { %v988_v29 = vmul.f32 %v1442_v8, %v495_v37  ;;  %v409_v35 = vmul.f32 %v1428_v1, %v335_v30  ;;  %v339_v58 = vpop.permute.xlu1 %338  ;;  %v503_v46 = vpop.permute.xlu0 %502  ;;  %v436_v24 = vadd.f32 %v408_v55, %v1613_v51  ;;  %v606_v40 = vadd.f32 %v578_v23, %v434_v25  ;;  %v2236_v37 = vld [vmem:[#allocation14_spill] sm:$0xff] }
  0xfc   : > { %v1087_v44 = vsel %vm1078_vm1, %v1049_v41, 0.0  ;;  %v1147_v28 = vmul.f32 %v1049_v41, %v1049_v41  ;;  %v811_v62 = vadd.f32 %v783_v47, %v743_v22  ;;  %v718_v53 = vmul.f32 %v1434_v4, %v335_v30  ;;  %v2237_v22 = vld [vmem:[#allocation15_spill] sm:$0xff] }
  0xfd   : > { %v1088_v45 = vadd.f32 %v1087_v44, %v1086_v10  ;;  %v1016_v0 = vadd.f32 %v988_v29, %v948_v19  ;;  %v677_v48 = vadd.f32 %v1617_v32, %v606_v40  ;;  %v437_v18 = vadd.f32 %v409_v35, %v2236_v37  ;;  %v2238_v29 = vld [vmem:[#allocation16_spill] sm:$0xff] }
  0xfe   : > { %v1179_v59 = vsel %vm1078_vm1, %v1147_v28, 0.0  ;;  %v923_v50 = vmul.f32 %v1440_v7, %v335_v30  ;;  %v882_v42 = vadd.f32 %v1621_v11, %v811_v62  ;;  %v579_v51 = vmul.f32 %v1430_v2, %v499_v49 }
  0xff   : > { %v1180_v13 = vadd.f32 %v1179_v59, %v1178_v14  ;;  %v1050_v36 = vadd.f32 %v1447_v9, %v1016_v0  ;;  %v343_v25 = vpop.permute.xlu1 %342  ;;  %v507_v27 = vpop.permute.xlu0 %506  ;;  %v744_v52 = vadd.f32 %v716_v54, %v676_v16  ;;  %v949_v55 = vadd.f32 %v921_v31, %v881_v34 }
 0x100   : > { %v784_v10 = vmul.f32 %v1436_v5, %v499_v49  ;;  %v989_v39 = vmul.f32 %v1442_v8, %v499_v49  ;;  %v607_v43 = vadd.f32 %v579_v51, %v435_v56  ;;  %v410_v30 = vmul.f32 %v1428_v1, %v339_v58 }
 0x101   : > { %v1089_v32 = vsel %vm1076_vm0, %v1050_v36, 0.0  ;;  %v1148_v38 = vmul.f32 %v1050_v36, %v1050_v36  ;;  %v719_v41 = vmul.f32 %v1434_v4, %v339_v58  ;;  %v924_v31 = vmul.f32 %v1440_v7, %v339_v58 }
 0x102   : > { %v1090_v19 = vadd.f32 %v1089_v32, %v1088_v45  ;;  %v812_v11 = vadd.f32 %v784_v10, %v744_v52  ;;  %v1017_v14 = vadd.f32 %v989_v39, %v949_v55  ;;  %v678_v54 = vadd.f32 %v2237_v22, %v607_v43  ;;  %v2240_v32 = vld [vmem:[#allocation20_spill] sm:$0xff] }
 0x103   : > { %v1181_v23 = vsel %vm1076_vm0, %v1148_v38, 0.0  ;;  %v745_v16 = vadd.f32 %v717_v63, %v677_v48  ;;  %v347_v34 = vpop.permute.xlu1 %346  ;;  %v511_v49 = vpop.permute.xlu0 %510  ;;  %v580_v44 = vmul.f32 %v1430_v2, %v503_v46  ;;  %v950_v28 = vadd.f32 %v922_v26, %v882_v42 }
 0x104   : > { %v1182_v47 = vadd.f32 %v1181_v23, %v1180_v13  ;;  %v883_v35 = vadd.f32 %v2238_v29, %v812_v11  ;;  %v1051_v56 = vadd.f32 %v1447_v9, %v1017_v14  ;;  %v785_v40 = vmul.f32 %v1436_v5, %v503_v46 }
 0x105   : > { %v990_v45 = vmul.f32 %v1442_v8, %v503_v46  ;;  %v411_v62 = vmul.f32 %v1428_v1, %v343_v25  ;;  %v438_v63 = vadd.f32 %v410_v30, %v1640_v15  ;;  %v608_v59 = vadd.f32 %v580_v44, %v436_v24  ;;  %v2239_v46 = vld [vmem:[#allocation17_spill] sm:$0xff] }
 0x106   : > { %v1091_v0 = vsel %vm1078_vm1, %v1051_v56, 0.0  ;;  %v1149_v58 = vmul.f32 %v1051_v56, %v1051_v56  ;;  %v813_v37 = vadd.f32 %v785_v40, %v745_v16  ;;  %v720_v36 = vmul.f32 %v1434_v4, %v343_v25  ;;  %v2242_v40 = vld [vmem:[#allocation19_spill] sm:$0xff] }
 0x107   : > { %v1092_v48 = vadd.f32 %v1091_v0, %v1090_v19  ;;  %v1018_v13 = vadd.f32 %v990_v45, %v950_v28  ;;  %v351_v51 = vpop.permute.xlu1 %350  ;;  %v515_v52 = vpop.permute.xlu0 %514  ;;  %v679_v42 = vadd.f32 %v1644_v33, %v608_v59  ;;  %v439_v55 = vadd.f32 %v411_v62, %v2239_v46 }
 0x108   : > { %v1183_v26 = vsel %vm1078_vm1, %v1149_v58, 0.0  ;;  %v925_v10 = vmul.f32 %v1440_v7, %v343_v25  ;;  %v884_v38 = vadd.f32 %v2240_v32, %v813_v37  ;;  %v581_v24 = vmul.f32 %v1430_v2, %v507_v27 }
 0x109   : > { %v1184_v39 = vadd.f32 %v1183_v26, %v1182_v47  ;;  %v1052_v15 = vadd.f32 %v1447_v9, %v1018_v13  ;;  %v746_v43 = vadd.f32 %v718_v53, %v678_v54  ;;  %v951_v30 = vadd.f32 %v923_v50, %v883_v35  ;;  %v2241_v50 = vld [vmem:[#allocation18_spill] sm:$0xff]  ;;  %v2243_v26 = vld [vmem:[#allocation24_spill] sm:$0xff] }
 0x10a   : > { %v786_v19 = vmul.f32 %v1436_v5, %v507_v27  ;;  %v991_v11 = vmul.f32 %v1442_v8, %v507_v27  ;;  %v609_v23 = vadd.f32 %v581_v24, %v437_v18  ;;  %v412_v22 = vmul.f32 %v1428_v1, %v347_v34  ;;  %v2244_v24 = vld [vmem:[#allocation25_spill] sm:$0xff] }
 0x10b   : > { %v1093_v14 = vsel %vm1076_vm0, %v1052_v15, 0.0  ;;  %v1150_v33 = vmul.f32 %v1052_v15, %v1052_v15  ;;  %v355_v25 = vpop.permute.xlu1 %354  ;;  %v519_v16 = vpop.permute.xlu0 %518  ;;  %v721_v44 = vmul.f32 %v1434_v4, %v347_v34  ;;  %v926_v35 = vmul.f32 %v1440_v7, %v347_v34 }
 0x10c   : > { %v1094_v47 = vadd.f32 %v1093_v14, %v1092_v48  ;;  %v814_v29 = vadd.f32 %v786_v19, %v746_v43  ;;  %v1019_v56 = vadd.f32 %v991_v11, %v951_v30  ;;  %v680_v54 = vadd.f32 %v2241_v50, %v609_v23  ;;  %v2245_v43 = vld [vmem:[#allocation21_spill] sm:$0xff]  ;;  %v2246_v14 = vld [vmem:[#allocation26_spill] sm:$0xff] }
 0x10d   : > { %v1185_v53 = vsel %vm1076_vm0, %v1150_v33, 0.0  ;;  %v747_v27 = vadd.f32 %v719_v41, %v679_v42  ;;  %v582_v62 = vmul.f32 %v1430_v2, %v511_v49  ;;  %v952_v0 = vadd.f32 %v924_v31, %v884_v38 }
 0x10e   : > { %v1186_v28 = vadd.f32 %v1185_v53, %v1184_v39  ;;  %v885_v45 = vadd.f32 %v2242_v40, %v814_v29  ;;  %v1053_v18 = vadd.f32 %v1447_v9, %v1019_v56  ;;  %v787_v58 = vmul.f32 %v1436_v5, %v511_v49 }
 0x10f   : > { %v992_v59 = vmul.f32 %v1442_v8, %v511_v49  ;;  %v413_v48 = vmul.f32 %v1428_v1, %v351_v51  ;;  %v359_v37 = vpop.permute.xlu1 %358  ;;  %v1878_v13 = vpop.permute.xlu0 %522  ;;  %v440_v42 = vadd.f32 %v412_v22, %v2243_v26  ;;  %v610_v46 = vadd.f32 %v582_v62, %v438_v63 }
 0x110   : > { %v1095_v34 = vsel %vm1078_vm1, %v1053_v18, 0.0  ;;  %v1151_v41 = vmul.f32 %v1053_v18, %v1053_v18  ;;  %v815_v32 = vadd.f32 %v787_v58, %v747_v27  ;;  %v722_v31 = vmul.f32 %v1434_v4, %v351_v51 }
 0x111   : > { %v1096_v39 = vadd.f32 %v1095_v34, %v1094_v47  ;;  %v1020_v15 = vadd.f32 %v992_v59, %v952_v0  ;;  %v681_v49 = vadd.f32 %v2244_v24, %v610_v46  ;;  %v441_v30 = vadd.f32 %v413_v48, %v2245_v43  ;;  %v2247_v48 = vld [vmem:[#allocation22_spill] sm:$0xff] }
 0x112   : > { %v1187_v38 = vsel %vm1078_vm1, %v1151_v41, 0.0  ;;  %v927_v19 = vmul.f32 %v1440_v7, %v351_v51  ;;  %v886_v33 = vadd.f32 %v2246_v14, %v815_v32  ;;  %v583_v63 = vmul.f32 %v1430_v2, %v515_v52 }
 0x113   : > { %v1188_v11 = vadd.f32 %v1187_v38, %v1186_v28  ;;  %v1054_v23 = vadd.f32 %v1447_v9, %v1020_v15  ;;  %v363_v22 = vpop.permute.xlu1 %362  ;;  %v1890_v47 = vpop.permute.xlu0 %526  ;;  %v748_v29 = vadd.f32 %v720_v36, %v680_v54  ;;  %v953_v56 = vadd.f32 %v925_v10, %v885_v45 }
 0x114   : > { %v788_v53 = vmul.f32 %v1436_v5, %v515_v52  ;;  %v993_v50 = vmul.f32 %v1442_v8, %v515_v52  ;;  %v611_v51 = vadd.f32 %v583_v63, %v439_v55  ;;  %v414_v28 = vmul.f32 %v1428_v1, %v355_v25  ;;  %v2248_v55 = vld [vmem:[#allocation23_spill] sm:$0xff] }
 0x115   : > { %v1097_v27 = vsel %vm1076_vm0, %v1054_v23, 0.0  ;;  %v1152_v40 = vmul.f32 %v1054_v23, %v1054_v23  ;;  %v723_v58 = vmul.f32 %v1434_v4, %v355_v25  ;;  %v928_v10 = vmul.f32 %v1440_v7, %v355_v25 }
 0x116   : > { %v1098_v18 = vadd.f32 %v1097_v27, %v1096_v39  ;;  %v816_v62 = vadd.f32 %v788_v53, %v748_v29  ;;  %v1021_v0 = vadd.f32 %v993_v50, %v953_v56  ;;  %v682_v36 = vadd.f32 %v2247_v48, %v611_v51  ;;  %v2249_v29 = vld [vmem:[#allocation27_spill] sm:$0xff] }
 0x117   : > { %v1189_v59 = vsel %vm1076_vm0, %v1152_v40, 0.0  ;;  %v749_v54 = vadd.f32 %v721_v44, %v681_v49  ;;  %v1900_v45 = vpop.permute.xlu1 %366  ;;  %v1902_v52 = vpop.permute.xlu0 %530  ;;  %v584_v46 = vmul.f32 %v1430_v2, %v519_v16  ;;  %v954_v39 = vadd.f32 %v926_v35, %v886_v33 }
 0x118   : > { %v1190_v34 = vadd.f32 %v1189_v59, %v1188_v11  ;;  %v887_v41 = vadd.f32 %v2248_v55, %v816_v62  ;;  %v1055_v26 = vadd.f32 %v1447_v9, %v1021_v0  ;;  %v789_v32 = vmul.f32 %v1436_v5, %v519_v16 }
 0x119   : > { %v994_v15 = vmul.f32 %v1442_v8, %v519_v16  ;;  %v415_v38 = vmul.f32 %v1428_v1, %v359_v37  ;;  %v442_v24 = vadd.f32 %v414_v28, %v1699_v12  ;;  %v612_v49 = vadd.f32 %v584_v46, %v440_v42  ;;  %v2250_v12 = vld [vmem:[#allocation30_spill] sm:$0xff] }
 0x11a   : > { %v1099_v25 = vsel %vm1078_vm1, %v1055_v26, 0.0  ;;  %v1153_v44 = vmul.f32 %v1055_v26, %v1055_v26  ;;  %v817_v11 = vadd.f32 %v789_v32, %v749_v54  ;;  %v724_v23 = vmul.f32 %v1434_v4, %v359_v37 }
 0x11b   : > { %v1100_v43 = vadd.f32 %v1099_v25, %v1098_v18  ;;  %v1022_v14 = vadd.f32 %v994_v15, %v954_v39  ;;  %v1913_v63 = vpop.permute.xlu1 %192  ;;  %v1915_v35 = vpop.permute.xlu0 %534  ;;  %v683_v16 = vadd.f32 %v1703_v60, %v612_v49  ;;  %v443_v56 = vadd.f32 %v415_v38, %v2249_v29 }
 0x11c   : > { %v1191_v33 = vsel %vm1078_vm1, %v1153_v44, 0.0  ;;  %v929_v53 = vmul.f32 %v1440_v7, %v359_v37  ;;  %v888_v42 = vadd.f32 %v2250_v12, %v817_v11  ;;  %v585_v40 = vmul.f32 %v1430_v2, %v1878_v13 }
 0x11d   : > { %v1192_v50 = vadd.f32 %v1191_v33, %v1190_v34  ;;  %v1056_v27 = vadd.f32 %v1447_v9, %v1022_v14  ;;  %v750_v51 = vadd.f32 %v722_v31, %v682_v36  ;;  %v955_v28 = vadd.f32 %v927_v19, %v887_v41  ;;  %v2251_v41 = vld [vmem:[#allocation28_spill] sm:$0xff] }
 0x11e   : > { %v790_v18 = vmul.f32 %v1436_v5, %v1878_v13  ;;  %v995_v60 = vmul.f32 %v1442_v8, %v1878_v13  ;;  %v613_v37 = vadd.f32 %v585_v40, %v441_v30  ;;  %v416_v59 = vmul.f32 %v1428_v1, %v363_v22  ;;  %v2252_v30 = vld [vmem:[#allocation29_spill] sm:$0xff] }
 0x11f   : > { %v1101_v62 = vsel %vm1076_vm0, %v1056_v27, 0.0  ;;  %v1154_v0 = vmul.f32 %v1056_v27, %v1056_v27  ;;  %v1931_v48 = vpop.permute.xlu1 %538  ;;  %v1933_v54 = vpop.permute.xlu0 %370  ;;  %v725_v19 = vmul.f32 %v1434_v4, %v363_v22  ;;  %v930_v13 = vmul.f32 %v1440_v7, %v363_v22  ;;  %v2253_v27 = vld [vmem:[#allocation31_spill] sm:$0xff] }
 0x120   : > { %v1102_v34 = vadd.f32 %v1101_v62, %v1100_v43  ;;  %v818_v55 = vadd.f32 %v790_v18, %v750_v51  ;;  %v1023_v31 = vadd.f32 %v995_v60, %v955_v28  ;;  %v684_v26 = vadd.f32 %v2251_v41, %v613_v37 }
 0x121   : > { %v1193_v36 = vsel %vm1076_vm0, %v1154_v0, 0.0  ;;  %v751_v46 = vadd.f32 %v723_v58, %v683_v16  ;;  %v586_v38 = vmul.f32 %v1430_v2, %v1890_v47  ;;  %v956_v25 = vadd.f32 %v928_v10, %v888_v42 }
 0x122   : > { %v1194_v39 = vadd.f32 %v1193_v36, %v1192_v50  ;;  %v889_v32 = vadd.f32 %v2252_v30, %v818_v55  ;;  %v1057_v15 = vadd.f32 %v1447_v9, %v1023_v31  ;;  %v791_v44 = vmul.f32 %v1436_v5, %v1890_v47 }
 0x123   : > { %v996_v49 = vmul.f32 %v1442_v8, %v1890_v47  ;;  %v417_v43 = vmul.f32 %v1428_v1, %v1900_v45  ;;  %v1949_v22 = vpop.permute.xlu1 %374  ;;  %v1951_v58 = vpop.permute.xlu0 %196  ;;  %v444_v33 = vadd.f32 %v416_v59, %v1742_v17  ;;  %v614_v16 = vadd.f32 %v586_v38, %v442_v24 }
 0x124   : > { %v1103_v11 = vsel %vm1078_vm1, %v1057_v15, 0.0  ;;  %v1155_v14 = vmul.f32 %v1057_v15, %v1057_v15  ;;  %v819_v29 = vadd.f32 %v791_v44, %v751_v46  ;;  %v726_v12 = vmul.f32 %v1434_v4, %v1900_v45 }
 0x125   : > { %v1104_v10 = vadd.f32 %v1103_v11, %v1102_v34  ;;  %v1024_v50 = vadd.f32 %v996_v49, %v956_v25  ;;  %v685_v42 = vadd.f32 %v1748_v21, %v614_v16  ;;  %v445_v40 = vadd.f32 %v417_v43, %v2253_v27  ;;  %v2254_v16 = vld [vmem:[#allocation11_spill] sm:$0xff] }
 0x126   : > { %v1195_v47 = vsel %vm1078_vm1, %v1155_v14, 0.0  ;;  %v931_v51 = vmul.f32 %v1440_v7, %v1900_v45  ;;  %v890_v18 = vadd.f32 %v1760_v61, %v819_v29  ;;  %v587_v24 = vmul.f32 %v1430_v2, %v1902_v52 }
 0x127   : > { %v1196_v28 = vadd.f32 %v1195_v47, %v1194_v39  ;;  %v1058_v17 = vadd.f32 %v1447_v9, %v1024_v50  ;;  %v1966_v60 = vpop.permute.xlu1 %203  ;;  %v1968_v62 = vpop.permute.xlu0 %542  ;;  %v752_v0 = vadd.f32 %v724_v23, %v684_v26  ;;  %v957_v37 = vadd.f32 %v929_v53, %v889_v32 }
 0x128   : > { %v792_v21 = vmul.f32 %v1436_v5, %v1902_v52  ;;  %v997_v45 = vmul.f32 %v1442_v8, %v1902_v52  ;;  %v615_v34 = vadd.f32 %v587_v24, %v443_v56  ;;  %v659_v55 = vmul.f32 %v1432_v3, %v1913_v63 }
 0x129   : > { %v1105_v59 = vsel %vm1076_vm0, %v1058_v17, 0.0  ;;  %v1156_v61 = vmul.f32 %v1058_v17, %v1058_v17  ;;  %v864_v23 = vmul.f32 %v1438_v6, %v1913_v63  ;;  %v753_v46 = vadd.f32 %v725_v19, %v685_v42 }
 0x12a   : > { %v1106_v31 = vadd.f32 %v1105_v59, %v1104_v10  ;;  %v820_v36 = vadd.f32 %v792_v21, %v752_v0  ;;  %v1025_v41 = vadd.f32 %v997_v45, %v957_v37  ;;  %v686_v26 = vadd.f32 %v1725_v20, %v615_v34 }
 0x12b   : > { %v1197_v53 = vsel %vm1076_vm0, %v1156_v61, 0.0  ;;  %v588_v52 = vmul.f32 %v1430_v2, %v1915_v35  ;;  %v1983_v39 = vpop.permute.xlu1 %546  ;;  %v1985_v56 = vpop.permute.xlu0 %378  ;;  %v793_v38 = vmul.f32 %v1436_v5, %v1915_v35  ;;  %v958_v25 = vadd.f32 %v930_v13, %v890_v18 }
 0x12c   : > { %v1198_v30 = vadd.f32 %v1197_v53, %v1196_v28  ;;  %v891_v32 = vadd.f32 %v1738_v57, %v820_v36  ;;  %v1059_v15 = vadd.f32 %v1447_v9, %v1025_v41  ;;  %v998_v20 = vmul.f32 %v1442_v8, %v1915_v35 }
 0x12d   : > { %v616_v44 = vadd.f32 %v588_v52, %v444_v33  ;;  %v589_v19 = vmul.f32 %v1430_v2, %v1931_v48  ;;  %v821_v11 = vadd.f32 %v793_v38, %v753_v46  ;;  %v794_v57 = vmul.f32 %v1436_v5, %v1931_v48 }
 0x12e   : > { %v1107_v49 = vsel %vm1078_vm1, %v1059_v15, 0.0  ;;  %v1157_v43 = vmul.f32 %v1059_v15, %v1059_v15  ;;  %v246_v10 = vmul.f32 %v2254_v16, %v1913_v63  ;;  %v1026_v29 = vadd.f32 %v998_v20, %v958_v25 }
 0x12f   : > { %v1108_v14 = vadd.f32 %v1107_v49, %v1106_v31  ;;  %v754_v13 = vadd.f32 %v726_v12, %v686_v26  ;;  %v2000_v33 = vpop.permute.xlu1 %382  ;;  %v2002_v50 = vpop.permute.xlu0 %207  ;;  %v617_v47 = vadd.f32 %v589_v19, %v445_v40  ;;  %v959_v42 = vadd.f32 %v931_v51, %v891_v32 }
 0x130   : > { %v1199_v35 = vsel %vm1078_vm1, %v1157_v43, 0.0  ;;  %v999_v27 = vmul.f32 %v1442_v8, %v1931_v48  ;;  %v1060_v18 = vadd.f32 %v1447_v9, %v1026_v29  ;;  %v418_v63 = vmul.f32 %v1428_v1, %v1933_v54 }
 0x131   : > { %v1200_v28 = vadd.f32 %v1199_v35, %v1198_v30  ;;  %v822_v17 = vadd.f32 %v794_v57, %v754_v13  ;;  %v687_v12 = vadd.f32 %v659_v55, %v616_v44  ;;  %v892_v0 = vadd.f32 %v864_v23, %v821_v11 }
 0x132   : > { %v1027_v24 = vadd.f32 %v999_v27, %v959_v42  ;;  %v727_v37 = vmul.f32 %v1434_v4, %v1933_v54  ;;  %v1109_v21 = vsel %vm1076_vm0, %v1060_v18, 0.0  ;;  %v1158_v40 = vmul.f32 %v1060_v18, %v1060_v18 }
 0x133   : > { %v932_v51 = vmul.f32 %v1440_v7, %v1933_v54  ;;  %v419_v48 = vmul.f32 %v1428_v1, %v1949_v22  ;;  %v2017_v45 = vpop.permute.xlu1 %214  ;;  %v2019_v59 = vpop.permute.xlu0 %550  ;;  %v1110_v61 = vadd.f32 %v1109_v21, %v1108_v14  ;;  %v446_v55 = vadd.f32 %v418_v63, %v246_v10 }
 0x134   : > { %v1061_v34 = vadd.f32 %v1447_v9, %v1027_v24  ;;  %v728_v31 = vmul.f32 %v1434_v4, %v1949_v22  ;;  %v1201_v36 = vsel %vm1076_vm0, %v1158_v40, 0.0  ;;  %v933_v41 = vmul.f32 %v1440_v7, %v1949_v22 }
 0x135   : > { %v247_v54 = vmul.f32 %v2254_v16, %v1951_v58  ;;  %v660_v23 = vmul.f32 %v1432_v3, %v1951_v58  ;;  %v1202_v53 = vadd.f32 %v1201_v36, %v1200_v28  ;;  %v865_v52 = vmul.f32 %v1438_v6, %v1951_v58 }
 0x136   : > { %v1111_v26 = vsel %vm1078_vm1, %v1061_v34, 0.0  ;;  %v1159_v46 = vmul.f32 %v1061_v34, %v1061_v34  ;;  %v755_v32 = vadd.f32 %v727_v37, %v687_v12  ;;  %v960_v15 = vadd.f32 %v932_v51, %v892_v0 }
 0x137   : > { %v1112_v30 = vadd.f32 %v1111_v26, %v1110_v61  ;;  %v447_v38 = vadd.f32 %v419_v48, %v247_v54  ;;  %v2034_v25 = vpop.permute.xlu1 %554  ;;  %v2036_v22 = vpop.permute.xlu0 %386  ;;  %v688_v20 = vadd.f32 %v660_v23, %v617_v47  ;;  %v893_v19 = vadd.f32 %v865_v52, %v822_v17 }
 0x138   : > { %v1203_v44 = vsel %vm1078_vm1, %v1159_v46, 0.0  ;;  %v661_v49 = vmul.f32 %v1432_v3, %v1966_v60  ;;  %v590_v11 = vmul.f32 %v1430_v2, %v1968_v62  ;;  %v795_v58 = vmul.f32 %v1436_v5, %v1968_v62 }
 0x139   : > { %v1204_v43 = vadd.f32 %v1203_v44, %v1202_v53  ;;  %v1000_v57 = vmul.f32 %v1442_v8, %v1968_v62  ;;  %v866_v14 = vmul.f32 %v1438_v6, %v1966_v60  ;;  %v591_v10 = vmul.f32 %v1430_v2, %v1983_v39 }
 0x13a   : > { %v796_v29 = vmul.f32 %v1436_v5, %v1983_v39  ;;  %v961_v13 = vadd.f32 %v933_v41, %v893_v19  ;;  %v618_v35 = vadd.f32 %v590_v11, %v446_v55  ;;  %v823_v47 = vadd.f32 %v795_v58, %v755_v32 }
 0x13b   : > { %v1028_v42 = vadd.f32 %v1000_v57, %v960_v15  ;;  %v1001_v27 = vmul.f32 %v1442_v8, %v1983_v39  ;;  %v2055_v28 = vpop.permute.xlu1 %390  ;;  %v2057_v18 = vpop.permute.xlu0 %218  ;;  %v248_v62 = vmul.f32 %v2254_v16, %v1966_v60  ;;  %v756_v17 = vadd.f32 %v728_v31, %v688_v20 }
 0x13c   : > { %v420_v63 = vmul.f32 %v1428_v1, %v1985_v56  ;;  %v729_v24 = vmul.f32 %v1434_v4, %v1985_v56  ;;  %v619_v0 = vadd.f32 %v591_v10, %v447_v38  ;;  %v689_v21 = vadd.f32 %v661_v49, %v618_v35 }
 0x13d   : > { %v1062_v12 = vadd.f32 %v1447_v9, %v1028_v42  ;;  %v1029_v37 = vadd.f32 %v1001_v27, %v961_v13  ;;  %v824_v39 = vadd.f32 %v796_v29, %v756_v17  ;;  %v894_v40 = vadd.f32 %v866_v14, %v823_v47 }
 0x13e   : > { %v448_v51 = vadd.f32 %v420_v63, %v248_v62  ;;  %v934_v48 = vmul.f32 %v1440_v7, %v1985_v56  ;;  %v421_v55 = vmul.f32 %v1428_v1, %v2000_v33  ;;  %v757_v54 = vadd.f32 %v729_v24, %v689_v21 }
 0x13f   : > { %v1113_v60 = vsel %vm1076_vm0, %v1062_v12, 0.0  ;;  %v1160_v61 = vmul.f32 %v1062_v12, %v1062_v12  ;;  %v1063_v34 = vadd.f32 %v1447_v9, %v1029_v37  ;;  %v2072_v31 = vpop.permute.xlu1 %562  ;;  %v2074_v36 = vpop.permute.xlu0 %558  ;;  %v730_v23 = vmul.f32 %v1434_v4, %v2000_v33 }
 0x140   : > { %v1114_v41 = vadd.f32 %v1113_v60, %v1112_v30  ;;  %v249_v56 = vmul.f32 %v2254_v16, %v2002_v50  ;;  %v662_v52 = vmul.f32 %v1432_v3, %v2002_v50  ;;  %v935_v30 = vmul.f32 %v1440_v7, %v2000_v33 }
 0x141   : > { %v1205_v53 = vsel %vm1076_vm0, %v1160_v61, 0.0  ;;  %v1115_v26 = vsel %vm1078_vm1, %v1063_v34, 0.0  ;;  %v1161_v46 = vmul.f32 %v1063_v34, %v1063_v34  ;;  %v867_v38 = vmul.f32 %v1438_v6, %v2002_v50 }
 0x142   : > { %v1206_v32 = vadd.f32 %v1205_v53, %v1204_v43  ;;  %v1116_v15 = vadd.f32 %v1115_v26, %v1114_v41  ;;  %v962_v20 = vadd.f32 %v934_v48, %v894_v40  ;;  %v449_v19 = vadd.f32 %v421_v55, %v249_v56 }
 0x143   : > { %v1207_v44 = vsel %vm1078_vm1, %v1161_v46, 0.0  ;;  %v690_v49 = vadd.f32 %v662_v52, %v619_v0  ;;  %v2089_v11 = vpop.permute.xlu1 %633  ;;  %v2091_v58 = vpop.permute.xlu0 %629  ;;  %v895_v14 = vadd.f32 %v867_v38, %v824_v39  ;;  %v663_v43 = vmul.f32 %v1432_v3, %v2017_v45 }
 0x144   : > { %v1208_v57 = vadd.f32 %v1207_v44, %v1206_v32  ;;  %v592_v33 = vmul.f32 %v1430_v2, %v2019_v59  ;;  %v868_v50 = vmul.f32 %v1438_v6, %v2017_v45  ;;  %v797_v10 = vmul.f32 %v1436_v5, %v2019_v59 }
 0x145   : > { %v1002_v29 = vmul.f32 %v1442_v8, %v2019_v59  ;;  %v593_v13 = vmul.f32 %v1430_v2, %v2034_v25  ;;  %v798_v47 = vmul.f32 %v1436_v5, %v2034_v25  ;;  %v963_v42 = vadd.f32 %v935_v30, %v895_v14 }
 0x146   : > { %v620_v35 = vadd.f32 %v592_v33, %v448_v51  ;;  %v1003_v27 = vmul.f32 %v1442_v8, %v2034_v25  ;;  %v825_v62 = vadd.f32 %v797_v10, %v757_v54  ;;  %v758_v63 = vadd.f32 %v730_v23, %v690_v49 }
 0x147   : > { %v1030_v17 = vadd.f32 %v1002_v29, %v962_v20  ;;  %v422_v24 = vmul.f32 %v1428_v1, %v2036_v22  ;;  %v702_v12 = vpop.permute.xlu1 %701  ;;  %v2111_v0 = vpop.permute.xlu0 %697  ;;  %v250_v59 = vmul.f32 %v2254_v16, %v2017_v45  ;;  %v621_v37 = vadd.f32 %v593_v13, %v449_v19 }
 0x148   : > { %v1031_v21 = vadd.f32 %v1003_v27, %v963_v42  ;;  %v826_v40 = vadd.f32 %v798_v47, %v758_v63  ;;  %v691_v51 = vadd.f32 %v663_v43, %v620_v35  ;;  %v731_v25 = vmul.f32 %v1434_v4, %v2036_v22 }
 0x149   : > { %v1064_v39 = vadd.f32 %v1447_v9, %v1030_v17  ;;  %v896_v60 = vadd.f32 %v868_v50, %v825_v62  ;;  %v450_v61 = vadd.f32 %v422_v24, %v250_v59  ;;  %v936_v34 = vmul.f32 %v1440_v7, %v2036_v22 }
 0x14a   : > { %v1065_v48 = vadd.f32 %v1447_v9, %v1031_v21  ;;  %v423_v45 = vmul.f32 %v1428_v1, %v2055_v28  ;;  %v732_v54 = vmul.f32 %v1434_v4, %v2055_v28  ;;  %v251_v52 = vmul.f32 %v2254_v16, %v2057_v18 }
 0x14b   : > { %v1117_v55 = vsel %vm1076_vm0, %v1064_v39, 0.0  ;;  %v1162_v41 = vmul.f32 %v1064_v39, %v1064_v39  ;;  %v770_v23 = vpop.permute.xlu1 %769  ;;  %v2126_v56 = vpop.permute.xlu0 %765  ;;  %v937_v32 = vmul.f32 %v1440_v7, %v2055_v28  ;;  %v664_v30 = vmul.f32 %v1432_v3, %v2057_v18 }
 0x14c   : > { %v1118_v53 = vadd.f32 %v1117_v55, %v1116_v15  ;;  %v1119_v26 = vsel %vm1078_vm1, %v1065_v48, 0.0  ;;  %v1163_v46 = vmul.f32 %v1065_v48, %v1065_v48  ;;  %v869_v38 = vmul.f32 %v1438_v6, %v2057_v18 }
 0x14d   : > { %v1209_v22 = vsel %vm1076_vm0, %v1162_v41, 0.0  ;;  %v595_v19 = vmul.f32 %v1430_v2, %v2072_v31  ;;  %v451_v49 = vadd.f32 %v423_v45, %v251_v52  ;;  %v692_v16 = vadd.f32 %v664_v30, %v621_v37 }
 0x14e   : > { %v1210_v44 = vadd.f32 %v1209_v22, %v1208_v57  ;;  %v1120_v20 = vadd.f32 %v1119_v26, %v1118_v53  ;;  %v1211_v15 = vsel %vm1078_vm1, %v1163_v46, 0.0  ;;  %v897_v14 = vadd.f32 %v869_v38, %v826_v40 }
 0x14f   : > { %v1005_v43 = vmul.f32 %v1442_v8, %v2072_v31  ;;  %v841_v28 = vpop.permute.xlu1 %840  ;;  %v800_v50 = vmul.f32 %v1436_v5, %v2072_v31  ;;  %v594_v18 = vmul.f32 %v1430_v2, %v2074_v36  ;;  %v799_v57 = vmul.f32 %v1436_v5, %v2074_v36 }
 0x150   : > { %v1212_v33 = vadd.f32 %v1211_v15, %v1210_v44  ;;  %v964_v10 = vadd.f32 %v936_v34, %v896_v60  ;;  %v760_v29 = vadd.f32 %v732_v54, %v692_v16  ;;  %v965_v13 = vadd.f32 %v937_v32, %v897_v14  ;;  %v837_v47 = vpop.permute.xlu0 %836 }
 0x151   : > { %v1004_v35 = vmul.f32 %v1442_v8, %v2074_v36  ;;  %v759_v42 = vadd.f32 %v731_v25, %v691_v51  ;;  %v623_v27 = vadd.f32 %v595_v19, %v451_v49  ;;  %v666_v62 = vmul.f32 %v1432_v3, %v2089_v11 }
 0x152   : > { %v665_v31 = vmul.f32 %v1432_v3, %v2091_v58  ;;  %v1033_v17 = vadd.f32 %v1005_v43, %v965_v13  ;;  %v622_v63 = vadd.f32 %v594_v18, %v450_v61  ;;  %v871_v59 = vmul.f32 %v1438_v6, %v2089_v11 }
 0x153   : > { %v1032_v24 = vadd.f32 %v1004_v35, %v964_v10  ;;  %v828_v37 = vadd.f32 %v800_v50, %v760_v29  ;;  %v827_v21 = vadd.f32 %v799_v57, %v759_v42  ;;  %v870_v36 = vmul.f32 %v1438_v6, %v2091_v58  ;;  %v909_v40 = vpop.permute.xlu1 %908 }
 0x154   : > { %v734_v39 = vmul.f32 %v1434_v4, %v702_v12  ;;  %v1067_v51 = vadd.f32 %v1447_v9, %v1033_v17  ;;  %v939_v48 = vmul.f32 %v1440_v7, %v702_v12  ;;  %v733_v60 = vmul.f32 %v1434_v4, %v2111_v0  ;;  %v905_v53 = vpop.permute.xlu0 %904 }
 0x155   : > { %v1066_v25 = vadd.f32 %v1447_v9, %v1032_v24  ;;  %v694_v61 = vadd.f32 %v666_v62, %v623_v27  ;;  %v693_v34 = vadd.f32 %v665_v31, %v622_v63  ;;  %v938_v11 = vmul.f32 %v1440_v7, %v2111_v0 }
 0x156   : > { %v802_v55 = vmul.f32 %v1436_v5, %v770_v23  ;;  %v899_v45 = vadd.f32 %v871_v59, %v828_v37  ;;  %v898_v54 = vadd.f32 %v870_v36, %v827_v21  ;;  %v1165_v26 = vmul.f32 %v1067_v51, %v1067_v51 }
 0x157   : > { %v1121_v58 = vsel %vm1076_vm0, %v1066_v25, 0.0  ;;  %v1164_v41 = vmul.f32 %v1066_v25, %v1066_v25  ;;  %v762_v52 = vadd.f32 %v734_v39, %v694_v61  ;;  %v761_v22 = vadd.f32 %v733_v60, %v693_v34  ;;  %v977_v19 = vpop.permute.xlu1 %976 }
 0x158   : > { %v1122_v46 = vadd.f32 %v1121_v58, %v1120_v20  ;;  %v967_v12 = vadd.f32 %v939_v48, %v899_v45  ;;  %v966_v32 = vadd.f32 %v938_v11, %v898_v54  ;;  %v1007_v30 = vmul.f32 %v1442_v8, %v770_v23  ;;  %v973_v29 = vpop.permute.xlu0 %972 }
 0x159   : > { %v1213_v38 = vsel %vm1076_vm0, %v1164_v41, 0.0  ;;  %v830_v44 = vadd.f32 %v802_v55, %v762_v52  ;;  %v801_v0 = vmul.f32 %v1436_v5, %v2126_v56  ;;  %v1006_v15 = vmul.f32 %v1442_v8, %v2126_v56 }
 0x15a   : > { %v1035_v49 = vadd.f32 %v1007_v30, %v967_v12  ;;  %v873_v16 = vmul.f32 %v1438_v6, %v841_v28  ;;  %v872_v20 = vmul.f32 %v1438_v6, %v837_v47  ;;  %v941_v14 = vmul.f32 %v1440_v7, %v909_v40 }
 0x15b   : > { %v829_v43 = vadd.f32 %v801_v0, %v761_v22  ;;  %v1034_v50 = vadd.f32 %v1006_v15, %v966_v32  ;;  %v940_v23 = vmul.f32 %v1440_v7, %v905_v53  ;;  %v1214_v18 = vadd.f32 %v1213_v38, %v1212_v33 }
 0x15c   : > { %v901_v57 = vadd.f32 %v873_v16, %v830_v44  ;;  %v1009_v10 = vmul.f32 %v1442_v8, %v977_v19  ;;  %v1123_v13 = vsel %vm1078_vm1, %v1067_v51, 0.0  ;;  %v1069_v56 = vadd.f32 %v1447_v9, %v1035_v49 }
 0x15d   : > { %v1068_v35 = vadd.f32 %v1447_v9, %v1034_v50  ;;  %v900_v28 = vadd.f32 %v872_v20, %v829_v43  ;;  %v1215_v47 = vsel %vm1078_vm1, %v1165_v26, 0.0  ;;  %v1124_v42 = vadd.f32 %v1123_v13, %v1122_v46  ;;  %v2255_v43 = vld [vmem:[#allocation13_spill] sm:$0xff] }
 0x15e   : > { %v969_v27 = vadd.f32 %v941_v14, %v901_v57  ;;  %v1008_v33 = vmul.f32 %v1442_v8, %v973_v29  ;;  %v1216_v63 = vadd.f32 %v1215_v47, %v1214_v18  ;;  %v1167_v37 = vmul.f32 %v1069_v56, %v1069_v56  ;;  %v2256_v18 = vld [vmem:[#allocation12_spill] sm:$0xff] }
 0x15f   : > { %v1125_v62 = vsel %vm1076_vm0, %v1068_v35, 0.0  ;;  %v1166_v31 = vmul.f32 %v1068_v35, %v1068_v35  ;;  %v968_v17 = vadd.f32 %v940_v23, %v900_v28  ;;  %v1127_v51 = vsel %vm1078_vm1, %v1069_v56, 0.0 }
 0x160   : > { %v1126_v24 = vadd.f32 %v1125_v62, %v1124_v42  ;;  %v1037_v59 = vadd.f32 %v1009_v10, %v969_v27  ;;  %v1219_v60 = vsel %vm1078_vm1, %v1167_v37, 0.0  ;;  %v1139_v19 = vstv %s1075_s27 }
 0x161   : > { %v1217_v21 = vsel %vm1076_vm0, %v1166_v31, 0.0  ;;  %v1036_v36 = vadd.f32 %v1008_v33, %v968_v17 }
 0x162   : > { %v1218_v39 = vadd.f32 %v1217_v21, %v1216_v63  ;;  %v1071_v40 = vadd.f32 %v1447_v9, %v1037_v59  ;;  %v1128_v48 = vadd.f32 %v1127_v51, %v1126_v24 }
 0x163   : > { %v1070_v25 = vadd.f32 %v1447_v9, %v1036_v36 }
 0x164   : > { %v1169_v61 = vmul.f32 %v1071_v40, %v1071_v40  ;;  %v1220_v55 = vadd.f32 %v1219_v60, %v1218_v39  ;;  %v1131_v41 = vsel %vm1078_vm1, %v1071_v40, 0.0 }
 0x165   : > { %v1129_v34 = vsel %vm1076_vm0, %v1070_v25, 0.0  ;;  %v1168_v11 = vmul.f32 %v1070_v25, %v1070_v25 }
 0x166   : > { %v1130_v58 = vadd.f32 %v1129_v34, %v1128_v48  ;;  %v1223_v26 = vsel %vm1078_vm1, %v1169_v61, 0.0 }
 0x167   : > { %v1221_v45 = vsel %vm1076_vm0, %v1168_v11, 0.0 }
 0x168   : > { %v1132_v54 = vadd.f32 %v1131_v41, %v1130_v58  ;;  %v1222_v53 = vadd.f32 %v1221_v45, %v1220_v55 }
 0x16a   : > { %v1133_v46 = vrot.slane %v1132_v54, 4  ;;  %v1224_v52 = vadd.f32 %v1223_v26, %v1222_v53 }
 0x16c   : > { %v1134_v12 = vadd.f32 %v1133_v46, %v1132_v54  ;;  %v1225_v22 = vrot.slane %v1224_v52, 4 }
 0x16e   : > { %v1135_v32 = vrot.slane %v1134_v12, 2  ;;  %v1226_v30 = vadd.f32 %v1225_v22, %v1224_v52 }
 0x170   : > { %v1136_v38 = vadd.f32 %v1135_v32, %v1134_v12  ;;  %v1227_v44 = vrot.slane %v1226_v30, 2 }
 0x172   : > { %v1137_v0 = vrot.slane %v1136_v38, 1  ;;  %v1228_v15 = vadd.f32 %v1227_v44, %v1226_v30 }
 0x174   : > { %v1138_v49 = vadd.f32 %v1137_v0, %v1136_v38  ;;  %v1229_v16 = vrot.slane %v1228_v15, 1 }
 0x176   : > { %v1140_v20 = vmul.f32 %v1139_v19, %v1138_v49  ;;  %v1230_v14 = vadd.f32 %v1229_v16, %v1228_v15 }
 0x178   : > { %v1141_v50 = vadd.f32 %v2255_v43, %v1140_v20   ;;  %v1231_v23 = vmul.f32 %v1230_v14, %v1139_v19  ;;  %58 = sbr.rel (!%p56_p11) target bundleno = 33 (0x21), region = 48 }
 0x17a   : > { %v1232_v57 = vadd.f32 %v2256_v18, %v1231_v23   ;;  %v2258_v11 = vmov %v1141_v50  ;;  %1234 = vst.msk [vmem:[#allocation7] sm:$0x1] (%p56_p11), %vm1233_vm2, %v1141_v50 }
 0x17c   : > { %v2257_v10 = vmov %v1232_v57  ;;  %1235 = vst.msk [vmem:[#allocation7 + $0x1] sm:$0x1] (%p56_p11), %vm1233_vm2, %v1232_v57 }
 0x17d   :  { %1356 = shalt.err (!%p1353_p2)
}
 0x17e   :  { %1245 = dma.vmem_to_hbm [thread:$0]  %s1243_s29, 32, %s2211_s3, [#allocation4]  }
 0x17f   :  { %1381 = dma.done.wait [#allocation4], 32  }
 0x180   :  { %1382 = vsyncadd [#allocation4], 4294967264 }
 0x181   :  { %1249 = vsyncpa [#allocation3], 1 }
 0x182   :  { %1250 = vsyncpa [#allocation6], 1 }
 0x183   :  { %1251 = vsyncpa [#allocation4], 1 }

</bundles_post_ra>
